<compile_context>
chip_gen: v6e
topology: v6e:2x2x1
jax: 0.10.0
libtpu: 0.0.40
codegen_flags: <defaults>
</compile_context>

<pallas_src>
import math
import functools

import jax
import jax.numpy as jnp
from jax import lax
from jax.experimental import pallas as pl
from jax.experimental.pallas import tpu as pltpu


# ----------------------------- helpers --------------------------------------

def _row_tile(m, cap=512):
    """Pick a row tile: full if small, else a multiple of 8 dividing m."""
    if m <= cap:
        return m
    for t in (512, 256, 128, 64, 32, 16, 8):
        if m % t == 0:
            return t
    return m


def _col_tile(n, cap=512):
    """Pick an output-feature tile: full if small, else a multiple of 128 dividing n."""
    if n <= cap:
        return n
    for t in (512, 384, 256, 128):
        if n % t == 0:
            return t
    return n


def _seq_tile(s, cap=512):
    """Key-sequence tile for flash attention."""
    if s <= cap:
        return s
    for t in (512, 256, 128):
        if s % t == 0:
            return t
    return s


def _ff_tile(f, cap=1024):
    """d_ff tile for the SwiGLU accumulator loop."""
    if f <= cap:
        return f
    for t in (1024, 512, 256, 128):
        if f % t == 0:
            return t
    return f


def _vmem_limit_bytes():
    # v5e/v6e: 128 MiB physical VMEM -> raise the scoped limit to 64 MiB.
    # v7x:      64 MiB physical     -> keep headroom at 48 MiB.
    try:
        phys = pltpu.get_tpu_info().vmem_capacity_bytes
        return 48 * 1024 * 1024 if phys <= 64 * 1024 * 1024 else 64 * 1024 * 1024
    except Exception:
        return 48 * 1024 * 1024


_VMEM_LIMIT = _vmem_limit_bytes()
NEG_INF = -1.0e30  # finite "masked" score: avoids NaN for fully-masked rows


def _cparams(sems):
    if isinstance(sems, int):
        sems = ("parallel",) * sems
    return pltpu.CompilerParams(
        dimension_semantics=tuple(sems),
        vmem_limit_bytes=_VMEM_LIMIT,
    )


# ----------------------------- Pallas kernels -------------------------------

def norm_linear_kernel(x_ref, nw_ref, w_ref, b_ref, o_ref):
    # RMSNorm(x) @ W + b      (cross-attn Q proj and final vocab projection). W is bf16.
    x = x_ref[...]
    inv = lax.rsqrt(jnp.mean(x * x, axis=-1, keepdims=True) + 1e-6)
    xn = ((x * inv) * nw_ref[...]).astype(jnp.bfloat16)
    o_ref[...] = (
        jnp.dot(xn, w_ref[...], preferred_element_type=jnp.float32) + b_ref[...]
    ).astype(o_ref.dtype)


def norm_qkv_kernel(x_ref, nw_ref, w_ref, b_ref, q_ref, k_ref, v_ref, *, d_model):
    # Fused RMSNorm + concatenated Q|K|V projection (one (D, 3D) bf16 matmul), bf16 out.
    x = x_ref[...]
    inv = lax.rsqrt(jnp.mean(x * x, axis=-1, keepdims=True) + 1e-6)
    xn = ((x * inv) * nw_ref[...]).astype(jnp.bfloat16)
    h = jnp.dot(xn, w_ref[...], preferred_element_type=jnp.float32) + b_ref[...]
    q_ref[...] = h[:, :d_model].astype(q_ref.dtype)
    k_ref[...] = h[:, d_model:2 * d_model].astype(k_ref.dtype)
    v_ref[...] = h[:, 2 * d_model:].astype(v_ref.dtype)


def norm_kv_kernel(x_ref, nw_ref, w_ref, b_ref, k_ref, v_ref, *, d_model):
    # Fused RMSNorm (encoder final norm) + concatenated K|V projection, bf16 out.
    x = x_ref[...]
    inv = lax.rsqrt(jnp.mean(x * x, axis=-1, keepdims=True) + 1e-6)
    xn = ((x * inv) * nw_ref[...]).astype(jnp.bfloat16)
    h = jnp.dot(xn, w_ref[...], preferred_element_type=jnp.float32) + b_ref[...]
    k_ref[...] = h[:, :d_model].astype(k_ref.dtype)
    v_ref[...] = h[:, d_model:].astype(v_ref.dtype)


def out_res_kernel(a_ref, w_ref, b_ref, g_ref, r_ref, o_ref):
    # residual + LayerScale(out_proj(attn));  attn and W are bf16, residual f32.
    y = jnp.dot(a_ref[...], w_ref[...], preferred_element_type=jnp.float32) + b_ref[...]
    o_ref[...] = r_ref[...] + g_ref[...] * y


def ffn_res_kernel(x_ref, nw_ref, w1_ref, b1_ref, w2_ref, b2_ref, w3_ref, b3_ref,
                   g_ref, o_ref, acc_ref):
    # x + LayerScale( W3( (W1 nx) * sigmoid(W2 nx) ) ),  nx = RMSNorm(x).
    # d_ff is tiled on grid axis 1 ('arbitrary'); partial SwiGLU chunks accumulate in f32.
    f = pl.program_id(1)

    @pl.when(f == 0)
    def _():
        acc_ref[...] = jnp.zeros_like(acc_ref)

    x = x_ref[...]
    inv = lax.rsqrt(jnp.mean(x * x, axis=-1, keepdims=True) + 1e-6)
    xn = ((x * inv) * nw_ref[...]).astype(jnp.bfloat16)
    h1 = jnp.dot(xn, w1_ref[...], preferred_element_type=jnp.float32) + b1_ref[...]
    h2 = jnp.dot(xn, w2_ref[...], preferred_element_type=jnp.float32) + b2_ref[...]
    gated = (h1 * jax.nn.sigmoid(h2)).astype(jnp.bfloat16)
    acc_ref[...] += jnp.dot(gated, w3_ref[...], preferred_element_type=jnp.float32)

    @pl.when(f == pl.num_programs(1) - 1)
    def _():
        o_ref[...] = x + g_ref[...] * (acc_ref[...] + b3_ref[...])


def flash_mha_kernel(q_ref, k_ref, v_ref, cq_ref, sq_ref, ck_ref, sk_ref, valid_ref,
                     o_ref, m_sc, l_sc, acc_sc, *, causal):
    # Flash attention for one (batch, head); grid axis 2 streams Sk tiles (online softmax).
    # cq/sq already carry 1/sqrt(dh); sq/sk carry the rotate_half sign.  RoPE in f32.
    kt = pl.program_id(2)
    tk = k_ref.shape[2]
    Sq = q_ref.shape[2]
    dh = q_ref.shape[3]
    half = dh // 2

    @pl.when(kt == 0)
    def _():
        m_sc[...] = jnp.full_like(m_sc, NEG_INF)
        l_sc[...] = jnp.zeros_like(l_sc)
        acc_sc[...] = jnp.zeros_like(acc_sc)

    def roll_half(t):
        # rotate_half with the sign folded into the (pre-signed) sin table.
        return jnp.concatenate([t[:, half:], t[:, :half]], axis=-1)

    q = q_ref[0, 0].astype(jnp.float32)                       # (Sq, dh)
    k = k_ref[0, 0].astype(jnp.float32)                       # (tk, dh)
    qr = (q * cq_ref[...] + roll_half(q) * sq_ref[...]).astype(jnp.bfloat16)
    kr = (k * ck_ref[...] + roll_half(k) * sk_ref[...]).astype(jnp.bfloat16)

    s = lax.dot_general(qr, kr, dimension_numbers=(((1,), (1,)), ((), ())),
                        preferred_element_type=jnp.float32)   # (Sq, tk)

    mask = valid_ref[0] > 0.5                                 # (1, tk) key padding mask
    if causal:
        qpos = lax.broadcasted_iota(jnp.int32, (Sq, tk), 0)
        kpos = lax.broadcasted_iota(jnp.int32, (Sq, tk), 1) + kt * tk
        mask = jnp.logical_and(mask, qpos >= kpos)
    s = jnp.where(mask, s, NEG_INF)

    m_prev = m_sc[...]
    m_new = jnp.maximum(m_prev, jnp.max(s, axis=-1, keepdims=True))
    alpha = jnp.exp(m_prev - m_new)
    p = jnp.exp(s - m_new)
    l_sc[...] = alpha * l_sc[...] + jnp.sum(p, axis=-1, keepdims=True)
    acc_sc[...] = alpha * acc_sc[...] + jnp.dot(
        p.astype(jnp.bfloat16), v_ref[0, 0], preferred_element_type=jnp.float32)
    m_sc[...] = m_new

    @pl.when(kt == pl.num_programs(2) - 1)
    def _():
        o_ref[0, 0] = (acc_sc[...] * pl.reciprocal(l_sc[...], approx=True)
                       ).astype(o_ref.dtype)


# ----------------------------- kernel wrappers -------------------------------

def norm_linear(x2d, nw, w, b, out_dtype=jnp.float32):
    M, D = x2d.shape
    N = w.shape[1]
    tm = _row_tile(M, cap=1024)
    tn = _col_tile(N)
    # Vocab/output-feature tile is the OUTER grid axis so each (D, tn) weight block is
    # DMA'd exactly once and stays resident while the row tiles stream past it.
    return pl.pallas_call(
        norm_linear_kernel,
        out_shape=jax.ShapeDtypeStruct((M, N), out_dtype),
        grid=(N // tn, M // tm),
        in_specs=[pl.BlockSpec((tm, D), lambda j, i: (i, 0)),
                  pl.BlockSpec((1, D), lambda j, i: (0, 0)),
                  pl.BlockSpec((D, tn), lambda j, i: (0, j)),
                  pl.BlockSpec((1, tn), lambda j, i: (0, j))],
        out_specs=pl.BlockSpec((tm, tn), lambda j, i: (i, j)),
        compiler_params=_cparams(2),
        cost_estimate=pl.CostEstimate(
            flops=2 * M * D * N, transcendentals=0,
            bytes_accessed=4 * M * D + 2 * D * N + 4 * M * N),
    )(x2d, nw, w, b)


def norm_qkv(x2d, nw, wqkv, bqkv, d_model):
    M, D = x2d.shape
    tm = _row_tile(M)
    kern = functools.partial(norm_qkv_kernel, d_model=d_model)
    return pl.pallas_call(
        kern,
        out_shape=[jax.ShapeDtypeStruct((M, D), jnp.bfloat16) for _ in range(3)],
        grid=(M // tm,),
        in_specs=[pl.BlockSpec((tm, D), lambda i: (i, 0)),
                  pl.BlockSpec((1, D), lambda i: (0, 0)),
                  pl.BlockSpec((D, 3 * D), lambda i: (0, 0)),
                  pl.BlockSpec((1, 3 * D), lambda i: (0, 0))],
        out_specs=[pl.BlockSpec((tm, D), lambda i: (i, 0)) for _ in range(3)],
        compiler_params=_cparams(1),
        cost_estimate=pl.CostEstimate(
            flops=2 * M * D * 3 * D, transcendentals=0,
            bytes_accessed=4 * M * D + 2 * (3 * D * D + 3 * M * D)),
    )(x2d, nw, wqkv, bqkv)


def norm_kv(x2d, nw, wkv, bkv, d_model):
    M, D = x2d.shape
    tm = _row_tile(M)
    kern = functools.partial(norm_kv_kernel, d_model=d_model)
    return pl.pallas_call(
        kern,
        out_shape=[jax.ShapeDtypeStruct((M, D), jnp.bfloat16) for _ in range(2)],
        grid=(M // tm,),
        in_specs=[pl.BlockSpec((tm, D), lambda i: (i, 0)),
                  pl.BlockSpec((1, D), lambda i: (0, 0)),
                  pl.BlockSpec((D, 2 * D), lambda i: (0, 0)),
                  pl.BlockSpec((1, 2 * D), lambda i: (0, 0))],
        out_specs=[pl.BlockSpec((tm, D), lambda i: (i, 0)) for _ in range(2)],
        compiler_params=_cparams(1),
    )(x2d, nw, wkv, bkv)


def out_res(a2d, w, b, gamma, resid2d):
    M, D = a2d.shape
    tm = _row_tile(M, cap=1024)
    return pl.pallas_call(
        out_res_kernel,
        out_shape=jax.ShapeDtypeStruct((M, D), jnp.float32),
        grid=(M // tm,),
        in_specs=[pl.BlockSpec((tm, D), lambda i: (i, 0)),
                  pl.BlockSpec((D, D), lambda i: (0, 0)),
                  pl.BlockSpec((1, D), lambda i: (0, 0)),
                  pl.BlockSpec((1, D), lambda i: (0, 0)),
                  pl.BlockSpec((tm, D), lambda i: (i, 0))],
        out_specs=pl.BlockSpec((tm, D), lambda i: (i, 0)),
        compiler_params=_cparams(1),
    )(a2d, w, b, gamma, resid2d)


def ffn_res(x2d, nw, ff):
    M, D = x2d.shape
    F = ff["w1"].shape[1]
    tm = _row_tile(M)
    tf = _ff_tile(F)
    return pl.pallas_call(
        ffn_res_kernel,
        out_shape=jax.ShapeDtypeStruct((M, D), jnp.float32),
        grid=(M // tm, F // tf),
        in_specs=[pl.BlockSpec((tm, D), lambda i, f: (i, 0)),
                  pl.BlockSpec((1, D), lambda i, f: (0, 0)),
                  pl.BlockSpec((D, tf), lambda i, f: (0, f)),
                  pl.BlockSpec((1, tf), lambda i, f: (0, f)),
                  pl.BlockSpec((D, tf), lambda i, f: (0, f)),
                  pl.BlockSpec((1, tf), lambda i, f: (0, f)),
                  pl.BlockSpec((tf, D), lambda i, f: (f, 0)),
                  pl.BlockSpec((1, D), lambda i, f: (0, 0)),
                  pl.BlockSpec((1, D), lambda i, f: (0, 0))],
        out_specs=pl.BlockSpec((tm, D), lambda i, f: (i, 0)),
        scratch_shapes=[pltpu.VMEM((tm, D), jnp.float32)],
        compiler_params=_cparams(("parallel", "arbitrary")),
        cost_estimate=pl.CostEstimate(
            flops=6 * M * D * F, transcendentals=M * F,
            bytes_accessed=8 * M * D + 2 * 3 * D * F),
    )(x2d, nw, ff["w1"], ff["b1"], ff["w2"], ff["b2"], ff["w3"], ff["b3"], ff["gamma"])


def flash_mha(q, k, v, cq, sq, ck, sk, kv_valid, causal):
    # q/k/v: (B, H, S, dh) bf16;  cq/sq: (Sq, dh);  ck/sk: (Sk, dh);  kv_valid: (B, 1, Sk).
    # TODO(synk): add an Sq grid axis (tiled queries) for very long query sequences.
    # TODO(synk): consider pipeline_mode=pl.Buffered(3) on the K/V BlockSpecs once Sk tiles
    #             are small relative to the VMEM budget.
    B, H, Sq, dh = q.shape
    Sk = k.shape[2]
    tk = _seq_tile(Sk)
    kern = functools.partial(flash_mha_kernel, causal=causal)
    return pl.pallas_call(
        kern,
        out_shape=jax.ShapeDtypeStruct((B, H, Sq, dh), jnp.bfloat16),
        grid=(B, H, Sk // tk),
        in_specs=[
            pl.BlockSpec((1, 1, Sq, dh), lambda b, h, t: (b, h, 0, 0)),
            pl.BlockSpec((1, 1, tk, dh), lambda b, h, t: (b, h, t, 0)),
            pl.BlockSpec((1, 1, tk, dh), lambda b, h, t: (b, h, t, 0)),
            pl.BlockSpec((Sq, dh), lambda b, h, t: (0, 0)),
            pl.BlockSpec((Sq, dh), lambda b, h, t: (0, 0)),
            pl.BlockSpec((tk, dh), lambda b, h, t: (t, 0)),
            pl.BlockSpec((tk, dh), lambda b, h, t: (t, 0)),
            pl.BlockSpec((1, 1, tk), lambda b, h, t: (b, 0, t)),
        ],
        out_specs=pl.BlockSpec((1, 1, Sq, dh), lambda b, h, t: (b, h, 0, 0)),
        scratch_shapes=[pltpu.VMEM((Sq, 1), jnp.float32),
                        pltpu.VMEM((Sq, 1), jnp.float32),
                        pltpu.VMEM((Sq, dh), jnp.float32)],
        compiler_params=_cparams(("parallel", "parallel", "arbitrary")),
        cost_estimate=pl.CostEstimate(
            flops=4 * B * H * Sq * Sk * dh,
            transcendentals=B * H * Sq * Sk,
            bytes_accessed=2 * B * H * (2 * Sq * dh + 2 * Sk * dh) + 4 * B * Sk),
    )(q, k, v, cq, sq, ck, sk, kv_valid)


# ----------------------------- model glue -----------------------------------

def rope_tables(dh, max_len, base=10000.0):
    inv_freq = 1.0 / (base ** (jnp.arange(0, dh, 2, dtype=jnp.float32) / dh))
    t = jnp.arange(max_len, dtype=jnp.float32)
    freqs = jnp.einsum("i,j->ij", t, inv_freq)
    emb = jnp.concatenate([freqs, freqs], axis=-1)        # (L, dh)
    cos = jnp.cos(emb)
    sin = jnp.sin(emb)
    half = dh // 2
    sign = jnp.concatenate([-jnp.ones((half,), jnp.float32),
                            jnp.ones((half,), jnp.float32)])
    # rotate_half(x) * sin == roll_by_half(x) * (sign * sin)
    return cos, sin * sign


def attention_block(q, k, v, cos, sin_s, kv_valid, causal, attn_p, resid, num_heads):
    # q: (B, Sq, D) bf16, k/v: (B, Sk, D) bf16, kv_valid: (B, Sk) f32, resid: (B, Sq, D) f32
    B, Sq, D = resid.shape
    Sk = k.shape[1]
    dh = D // num_heads
    qh = q.reshape(B, Sq, num_heads, dh).transpose(0, 2, 1, 3)
    kh = k.reshape(B, Sk, num_heads, dh).transpose(0, 2, 1, 3)
    vh = v.reshape(B, Sk, num_heads, dh).transpose(0, 2, 1, 3)
    scale = 1.0 / math.sqrt(dh)                 # folded into the q-side rotary tables
    attn = flash_mha(qh, kh, vh,
                     cos[:Sq] * scale, sin_s[:Sq] * scale,
                     cos[:Sk], sin_s[:Sk],
                     kv_valid.reshape(B, 1, Sk), causal)      # (B, H, Sq, dh) bf16
    a2d = attn.transpose(0, 2, 1, 3).reshape(B * Sq, D)
    out = out_res(a2d, attn_p["wo"], attn_p["bo"], attn_p["gamma"], resid.reshape(-1, D))
    return out.reshape(B, Sq, D)


def encoder_layer(x, p, src_valid, cos, sin_s, num_heads):
    B, S, D = x.shape
    sa = p["attn"]
    q, k, v = norm_qkv(x.reshape(-1, D), p["norm1_w"], sa["wqkv"], sa["bqkv"], D)
    x = attention_block(q.reshape(B, S, D), k.reshape(B, S, D), v.reshape(B, S, D),
                        cos, sin_s, src_valid, False, sa, x, num_heads)
    return ffn_res(x.reshape(-1, D), p["norm2_w"], p["ff"]).reshape(B, S, D)


def decoder_layer(x, enc_out, enc_norm_w, p, tgt_valid, src_valid, cos, sin_s, num_heads):
    B, St, D = x.shape
    Ss = enc_out.shape[1]
    # self-attention (causal + tgt padding)
    sa = p["self_attn"]
    q, k, v = norm_qkv(x.reshape(-1, D), p["norm1_w"], sa["wqkv"], sa["bqkv"], D)
    x = attention_block(q.reshape(B, St, D), k.reshape(B, St, D), v.reshape(B, St, D),
                        cos, sin_s, tgt_valid, True, sa, x, num_heads)
    # cross-attention (keys from encoder output; encoder final norm fused into KV proj)
    ca = p["cross_attn"]
    q2 = norm_linear(x.reshape(-1, D), p["norm2_w"], ca["wq"], ca["bq"],
                     out_dtype=jnp.bfloat16).reshape(B, St, D)
    k2, v2 = norm_kv(enc_out.reshape(-1, D), enc_norm_w, ca["wkv"], ca["bkv"], D)
    x = attention_block(q2, k2.reshape(B, Ss, D), v2.reshape(B, Ss, D),
                        cos, sin_s, src_valid, False, ca, x, num_heads)
    # feed forward
    return ffn_res(x.reshape(-1, D), p["norm3_w"], p["ff"]).reshape(B, St, D)


def transformer_forward(src_ids, tgt_ids, params, num_heads, pad_idx):
    B, Ss = src_ids.shape
    St = tgt_ids.shape[1]
    D = params["enc"]["embedding"].shape[1]
    dh = D // num_heads
    scale = math.sqrt(D)

    # Per-batch key-validity vectors (masks are generated inside the attention kernel).
    src_valid = (src_ids != pad_idx).astype(jnp.float32)   # (B, Ss)
    tgt_valid = (tgt_ids != pad_idx).astype(jnp.float32)   # (B, St)

    # rotary tables hoisted: computed once per forward, shared by all layers
    cos, sin_s = rope_tables(dh, max(Ss, St))

    # --- encoder ---
    # TODO(synk): embedding gather done with jnp.take (XLA); no blockwise Pallas win here.
    x = jnp.take(params["enc"]["embedding"], src_ids, axis=0) * scale
    for lp in params["enc"]["layers"]:
        x = encoder_layer(x, lp, src_valid, cos, sin_s, num_heads)
    enc_out = x   # encoder final RMSNorm is fused into the cross-attention KV projection

    # --- decoder ---
    y = jnp.take(params["dec"]["embedding"], tgt_ids, axis=0) * scale
    for lp in params["dec"]["layers"]:
        y = decoder_layer(y, enc_out, params["enc"]["norm_w"], lp,
                          tgt_valid, src_valid, cos, sin_s, num_heads)

    logits = norm_linear(y.reshape(-1, D), params["dec"]["norm_w"],
                         params["dec"]["wout"], params["dec"]["bout"],
                         out_dtype=jnp.float32)
    V = params["dec"]["wout"].shape[1]
    return logits.reshape(B, St, V)


# ----------------------------- parameter init --------------------------------

def init_linear(key, din, dout):
    k1, k2 = jax.random.split(key)
    bound = 1.0 / math.sqrt(din)
    # Weights stored bf16 in HBM (MXU operands); biases stay f32.
    w = jax.random.uniform(k1, (din, dout), jnp.float32, -bound, bound).astype(jnp.bfloat16)
    b = jax.random.uniform(k2, (1, dout), jnp.float32, -bound, bound)
    return w, b


def init_self_attn(key, d):
    ks = jax.random.split(key, 4)
    wq, bq = init_linear(ks[0], d, d)
    wk, bk = init_linear(ks[1], d, d)
    wv, bv = init_linear(ks[2], d, d)
    wo, bo = init_linear(ks[3], d, d)
    return dict(wqkv=jnp.concatenate([wq, wk, wv], axis=1),
                bqkv=jnp.concatenate([bq, bk, bv], axis=1),
                wo=wo, bo=bo,
                gamma=jnp.full((1, d), 1e-4, jnp.float32))


def init_cross_attn(key, d):
    ks = jax.random.split(key, 4)
    wq, bq = init_linear(ks[0], d, d)
    wk, bk = init_linear(ks[1], d, d)
    wv, bv = init_linear(ks[2], d, d)
    wo, bo = init_linear(ks[3], d, d)
    return dict(wq=wq, bq=bq,
                wkv=jnp.concatenate([wk, wv], axis=1),
                bkv=jnp.concatenate([bk, bv], axis=1),
                wo=wo, bo=bo,
                gamma=jnp.full((1, d), 1e-4, jnp.float32))


def init_ff(key, d, f):
    ks = jax.random.split(key, 3)
    w1, b1 = init_linear(ks[0], d, f)
    w2, b2 = init_linear(ks[1], d, f)
    w3, b3 = init_linear(ks[2], f, d)
    return dict(w1=w1, b1=b1, w2=w2, b2=b2, w3=w3, b3=b3,
                gamma=jnp.full((1, d), 1e-4, jnp.float32))


def init_encoder_layer(key, d, f):
    k1, k2 = jax.random.split(key)
    return dict(norm1_w=jnp.ones((1, d), jnp.float32),
                norm2_w=jnp.ones((1, d), jnp.float32),
                attn=init_self_attn(k1, d),
                ff=init_ff(k2, d, f))


def init_decoder_layer(key, d, f):
    k1, k2, k3 = jax.random.split(key, 3)
    return dict(norm1_w=jnp.ones((1, d), jnp.float32),
                norm2_w=jnp.ones((1, d), jnp.float32),
                norm3_w=jnp.ones((1, d), jnp.float32),
                self_attn=init_self_attn(k1, d),
                cross_attn=init_cross_attn(k2, d),
                ff=init_ff(k3, d, f))


def init_params(key, d_model, d_ff, n_enc, n_dec, vocab):
    keys = jax.random.split(key, 5)
    enc_keys = jax.random.split(keys[0], n_enc)
    dec_keys = jax.random.split(keys[1], n_dec)
    wout, bout = init_linear(keys[2], d_model, vocab)
    return dict(
        enc=dict(
            embedding=jax.random.normal(keys[3], (vocab, d_model), jnp.float32),
            layers=[init_encoder_layer(enc_keys[i], d_model, d_ff) for i in range(n_enc)],
            norm_w=jnp.ones((1, d_model), jnp.float32)),
        dec=dict(
            embedding=jax.random.normal(keys[4], (vocab, d_model), jnp.float32),
            layers=[init_decoder_layer(dec_keys[i], d_model, d_ff) for i in range(n_dec)],
            norm_w=jnp.ones((1, d_model), jnp.float32),
            wout=wout, bout=bout),
    )


# --------------------------------- main --------------------------------------

if __name__ == "__main__":
    B, S_SRC, S_TGT = 2, 8, 8
    D_MODEL, N_HEADS, D_FF = 32, 4, 64
    VOCAB, PAD_IDX = 64, 0
    N_ENC, N_DEC = 2, 2

    key = jax.random.PRNGKey(0)
    kp, ks, kt = jax.random.split(key, 3)

    params = init_params(kp, D_MODEL, D_FF, N_ENC, N_DEC, VOCAB)
    src = jax.random.randint(ks, (B, S_SRC), 1, VOCAB)
    tgt = jax.random.randint(kt, (B, S_TGT), 1, VOCAB)
    src = src.at[1, -1].set(PAD_IDX)   # exercise the padding-mask path

    fwd = jax.jit(functools.partial(transformer_forward,
                                    num_heads=N_HEADS, pad_idx=PAD_IDX))
    out = fwd(src, tgt, params)
    jax.block_until_ready(out)
    assert out.shape == (B, S_TGT, VOCAB)
    assert bool(jnp.all(jnp.isfinite(out)))
    print("KERNEL_OK")
</pallas_src>

<mosaic_0001>
module attributes {stable_mosaic.version = 11 : i64} {
  func.func @norm_qkv_kernel(%arg0: i32, %arg1: memref<16x32xf32, #tpu.memory_space<vmem>>, %arg2: memref<1x32xf32, #tpu.memory_space<vmem>>, %arg3: memref<32x96xbf16, #tpu.memory_space<vmem>>, %arg4: memref<1x96xf32, #tpu.memory_space<vmem>>, %arg5: memref<16x32xbf16, #tpu.memory_space<vmem>>, %arg6: memref<16x32xbf16, #tpu.memory_space<vmem>>, %arg7: memref<16x32xbf16, #tpu.memory_space<vmem>>) attributes {dimension_semantics = [#tpu.dimension_semantics<parallel>], iteration_bounds = array<i64: 1>, scalar_prefetch = 0 : i64, scratch_operands = 0 : i64, tpu.core_type = #tpu.core_type<tc>, window_params = [{transform_indices = @transform_0, window_bounds = array<i64: 16, 32>}, {pipeline_mode = #tpu.pipeline_mode<synchronous>, transform_indices = @transform_1, window_bounds = array<i64: 1, 32>}, {pipeline_mode = #tpu.pipeline_mode<synchronous>, transform_indices = @transform_2, window_bounds = array<i64: 32, 96>}, {pipeline_mode = #tpu.pipeline_mode<synchronous>, transform_indices = @transform_3, window_bounds = array<i64: 1, 96>}, {transform_indices = @transform_4, window_bounds = array<i64: 16, 32>}, {transform_indices = @transform_5, window_bounds = array<i64: 16, 32>}, {transform_indices = @transform_6, window_bounds = array<i64: 16, 32>}]} {
    %c0 = arith.constant 0 : index
    %c0_0 = arith.constant 0 : index
    %0 = vector.load %arg1[%c0, %c0_0] : memref<16x32xf32, #tpu.memory_space<vmem>>, vector<16x32xf32>
    %1 = arith.mulf %0, %0 : vector<16x32xf32>
    %cst = arith.constant dense<0.000000e+00> : vector<16xf32>
    %2 = vector.multi_reduction <add>, %1, %cst [1] : vector<16x32xf32> to vector<16xf32>
    %3 = vector.shape_cast %2 : vector<16xf32> to vector<16x1xf32>
    %cst_1 = arith.constant 3.200000e+01 : f32
    %4 = vector.broadcast %cst_1 : f32 to vector<16x1xf32>
    %5 = arith.divf %3, %4 : vector<16x1xf32>
    %cst_2 = arith.constant 9.99999997E-7 : f32
    %6 = vector.broadcast %cst_2 : f32 to vector<16x1xf32>
    %7 = arith.addf %5, %6 : vector<16x1xf32>
    %8 = math.rsqrt %7 : vector<16x1xf32>
    %9 = vector.broadcast %8 : vector<16x1xf32> to vector<16x32xf32>
    %10 = arith.mulf %0, %9 : vector<16x32xf32>
    %c0_3 = arith.constant 0 : index
    %c0_4 = arith.constant 0 : index
    %11 = vector.load %arg2[%c0_3, %c0_4] : memref<1x32xf32, #tpu.memory_space<vmem>>, vector<1x32xf32>
    %12 = vector.broadcast %11 : vector<1x32xf32> to vector<16x32xf32>
    %13 = arith.mulf %10, %12 : vector<16x32xf32>
    %14 = arith.truncf %13 : vector<16x32xf32> to vector<16x32xbf16>
    %c0_5 = arith.constant 0 : index
    %c0_6 = arith.constant 0 : index
    %15 = vector.load %arg3[%c0_5, %c0_6] : memref<32x96xbf16, #tpu.memory_space<vmem>>, vector<32x96xbf16>
    %cst_7 = arith.constant dense<0.000000e+00> : vector<16x96xf32>
    %16 = tpu.matmul %14, %15, %cst_7 {dimension_numbers = #tpu.dot_dimension_numbers<[1], [0], [0], [1], [0, 0, 1, 1], [], []>} : vector<16x32xbf16>, vector<32x96xbf16>, vector<16x96xf32> -> vector<16x96xf32>
    %c0_8 = arith.constant 0 : index
    %c0_9 = arith.constant 0 : index
    %17 = vector.load %arg4[%c0_8, %c0_9] : memref<1x96xf32, #tpu.memory_space<vmem>>, vector<1x96xf32>
    %18 = vector.broadcast %17 : vector<1x96xf32> to vector<16x96xf32>
    %19 = arith.addf %16, %18 : vector<16x96xf32>
    %20 = vector.extract_strided_slice %19 {offsets = [0, 0], sizes = [16, 32], strides = [1, 1]} : vector<16x96xf32> to vector<16x32xf32>
    %21 = arith.truncf %20 : vector<16x32xf32> to vector<16x32xbf16>
    %c0_10 = arith.constant 0 : index
    %c0_11 = arith.constant 0 : index
    %22 = vector.load %arg5[%c0_10, %c0_11] : memref<16x32xbf16, #tpu.memory_space<vmem>>, vector<16x32xbf16>
    tpu.vector_store %arg5[%c0_10, %c0_11], %21 {strides = array<i32>} : memref<16x32xbf16, #tpu.memory_space<vmem>>, vector<16x32xbf16>,
    %23 = vector.extract_strided_slice %19 {offsets = [0, 32], sizes = [16, 32], strides = [1, 1]} : vector<16x96xf32> to vector<16x32xf32>
    %24 = arith.truncf %23 : vector<16x32xf32> to vector<16x32xbf16>
    %c0_12 = arith.constant 0 : index
    %c0_13 = arith.constant 0 : index
    %25 = vector.load %arg6[%c0_12, %c0_13] : memref<16x32xbf16, #tpu.memory_space<vmem>>, vector<16x32xbf16>
    tpu.vector_store %arg6[%c0_12, %c0_13], %24 {strides = array<i32>} : memref<16x32xbf16, #tpu.memory_space<vmem>>, vector<16x32xbf16>,
    %26 = vector.extract_strided_slice %19 {offsets = [0, 64], sizes = [16, 32], strides = [1, 1]} : vector<16x96xf32> to vector<16x32xf32>
    %27 = arith.truncf %26 : vector<16x32xf32> to vector<16x32xbf16>
    %c0_14 = arith.constant 0 : index
    %c0_15 = arith.constant 0 : index
    %28 = vector.load %arg7[%c0_14, %c0_15] : memref<16x32xbf16, #tpu.memory_space<vmem>>, vector<16x32xbf16>
    tpu.vector_store %arg7[%c0_14, %c0_15], %27 {strides = array<i32>} : memref<16x32xbf16, #tpu.memory_space<vmem>>, vector<16x32xbf16>,
    return
  }
  func.func @transform_0(%arg0: i32) -> (i32, i32) {
    %c0_i32 = arith.constant 0 : i32
    %c0_i32_0 = arith.constant 0 : i32
    return %arg0, %c0_i32 : i32, i32
  }
  func.func @transform_1(%arg0: i32) -> (i32, i32) {
    %c0_i32 = arith.constant 0 : i32
    %c0_i32_0 = arith.constant 0 : i32
    %c0_i32_1 = arith.constant 0 : i32
    return %c0_i32, %c0_i32_0 : i32, i32
  }
  func.func @transform_2(%arg0: i32) -> (i32, i32) {
    %c0_i32 = arith.constant 0 : i32
    %c0_i32_0 = arith.constant 0 : i32
    %c0_i32_1 = arith.constant 0 : i32
    return %c0_i32, %c0_i32_0 : i32, i32
  }
  func.func @transform_3(%arg0: i32) -> (i32, i32) {
    %c0_i32 = arith.constant 0 : i32
    %c0_i32_0 = arith.constant 0 : i32
    %c0_i32_1 = arith.constant 0 : i32
    return %c0_i32, %c0_i32_0 : i32, i32
  }
  func.func @transform_4(%arg0: i32) -> (i32, i32) {
    %c0_i32 = arith.constant 0 : i32
    %c0_i32_0 = arith.constant 0 : i32
    return %arg0, %c0_i32 : i32, i32
  }
  func.func @transform_5(%arg0: i32) -> (i32, i32) {
    %c0_i32 = arith.constant 0 : i32
    %c0_i32_0 = arith.constant 0 : i32
    return %arg0, %c0_i32 : i32, i32
  }
  func.func @transform_6(%arg0: i32) -> (i32, i32) {
    %c0_i32 = arith.constant 0 : i32
    %c0_i32_0 = arith.constant 0 : i32
    return %arg0, %c0_i32 : i32, i32
  }
}

module attributes {stable_mosaic.version = 11 : i64} {
  func.func @flash_mha_kernel(%arg0: i32, %arg1: i32, %arg2: i32, %arg3: memref<1x1x8x8xbf16, #tpu.memory_space<vmem>>, %arg4: memref<1x1x8x8xbf16, #tpu.memory_space<vmem>>, %arg5: memref<1x1x8x8xbf16, #tpu.memory_space<vmem>>, %arg6: memref<8x8xf32, #tpu.memory_space<vmem>>, %arg7: memref<8x8xf32, #tpu.memory_space<vmem>>, %arg8: memref<8x8xf32, #tpu.memory_space<vmem>>, %arg9: memref<8x8xf32, #tpu.memory_space<vmem>>, %arg10: memref<1x1x8xf32, #tpu.memory_space<vmem>>, %arg11: memref<1x1x8x8xbf16, #tpu.memory_space<vmem>>, %arg12: memref<8x1xf32, #tpu.memory_space<vmem>>, %arg13: memref<8x1xf32, #tpu.memory_space<vmem>>, %arg14: memref<8x8xf32, #tpu.memory_space<vmem>>) attributes {dimension_semantics = [#tpu.dimension_semantics<parallel>, #tpu.dimension_semantics<parallel>, #tpu.dimension_semantics<arbitrary>], iteration_bounds = array<i64: 2, 4, 1>, scalar_prefetch = 0 : i64, scratch_operands = 3 : i64, tpu.core_type = #tpu.core_type<tc>, window_params = [{transform_indices = @transform_0, window_bounds = array<i64: 1, 1, 8, 8>}, {transform_indices = @transform_1, window_bounds = array<i64: 1, 1, 8, 8>}, {transform_indices = @transform_2, window_bounds = array<i64: 1, 1, 8, 8>}, {pipeline_mode = #tpu.pipeline_mode<synchronous>, transform_indices = @transform_3, window_bounds = array<i64: 8, 8>}, {pipeline_mode = #tpu.pipeline_mode<synchronous>, transform_indices = @transform_4, window_bounds = array<i64: 8, 8>}, {transform_indices = @transform_5, window_bounds = array<i64: 8, 8>}, {transform_indices = @transform_6, window_bounds = array<i64: 8, 8>}, {transform_indices = @transform_7, window_bounds = array<i64: 1, 1, 8>}, {transform_indices = @transform_8, window_bounds = array<i64: 1, 1, 8, 8>}]} {
    %c0_i32 = arith.constant 0 : i32
    %0 = arith.cmpi eq, %arg2, %c0_i32 : i32
    %1 = arith.extui %0 : i1 to i32
    %c0_i32_0 = arith.constant 0 : i32
    %2 = arith.cmpi ne, %1, %c0_i32_0 : i32
    scf.if %2 {
      %cst_42 = arith.constant -1.000000e+30 : f32
      %70 = vector.broadcast %cst_42 : f32 to vector<8x1xf32>
      %c0_43 = arith.constant 0 : index
      %c0_44 = arith.constant 0 : index
      %71 = vector.load %arg12[%c0_43, %c0_44] : memref<8x1xf32, #tpu.memory_space<vmem>>, vector<8x1xf32>
      tpu.vector_store %arg12[%c0_43, %c0_44], %70 {strides = array<i32>} : memref<8x1xf32, #tpu.memory_space<vmem>>, vector<8x1xf32>,
      %cst_45 = arith.constant 0.000000e+00 : f32
      %72 = vector.broadcast %cst_45 : f32 to vector<8x1xf32>
      %c0_46 = arith.constant 0 : index
      %c0_47 = arith.constant 0 : index
      %73 = vector.load %arg13[%c0_46, %c0_47] : memref<8x1xf32, #tpu.memory_space<vmem>>, vector<8x1xf32>
      tpu.vector_store %arg13[%c0_46, %c0_47], %72 {strides = array<i32>} : memref<8x1xf32, #tpu.memory_space<vmem>>, vector<8x1xf32>,
      %cst_48 = arith.constant 0.000000e+00 : f32
      %74 = vector.broadcast %cst_48 : f32 to vector<8x8xf32>
      %c0_49 = arith.constant 0 : index
      %c0_50 = arith.constant 0 : index
      %75 = vector.load %arg14[%c0_49, %c0_50] : memref<8x8xf32, #tpu.memory_space<vmem>>, vector<8x8xf32>
      tpu.vector_store %arg14[%c0_49, %c0_50], %74 {strides = array<i32>} : memref<8x8xf32, #tpu.memory_space<vmem>>, vector<8x8xf32>,
    } else {
    }
    %c0 = arith.constant 0 : index
    %c0_1 = arith.constant 0 : index
    %c0_2 = arith.constant 0 : index
    %c0_3 = arith.constant 0 : index
    %3 = vector.load %arg3[%c0, %c0_1, %c0_2, %c0_3] : memref<1x1x8x8xbf16, #tpu.memory_space<vmem>>, vector<1x1x8x8xbf16>
    %4 = vector.shape_cast %3 : vector<1x1x8x8xbf16> to vector<8x8xbf16>
    %5 = arith.extf %4 : vector<8x8xbf16> to vector<8x8xf32>
    %c0_4 = arith.constant 0 : index
    %c0_5 = arith.constant 0 : index
    %c0_6 = arith.constant 0 : index
    %c0_7 = arith.constant 0 : index
    %6 = vector.load %arg4[%c0_4, %c0_5, %c0_6, %c0_7] : memref<1x1x8x8xbf16, #tpu.memory_space<vmem>>, vector<1x1x8x8xbf16>
    %7 = vector.shape_cast %6 : vector<1x1x8x8xbf16> to vector<8x8xbf16>
    %8 = arith.extf %7 : vector<8x8xbf16> to vector<8x8xf32>
    %c0_8 = arith.constant 0 : index
    %c0_9 = arith.constant 0 : index
    %9 = vector.load %arg6[%c0_8, %c0_9] : memref<8x8xf32, #tpu.memory_space<vmem>>, vector<8x8xf32>
    %10 = arith.mulf %5, %9 : vector<8x8xf32>
    %11 = vector.extract_strided_slice %5 {offsets = [0, 4], sizes = [8, 4], strides = [1, 1]} : vector<8x8xf32> to vector<8x4xf32>
    %12 = vector.extract_strided_slice %5 {offsets = [0, 0], sizes = [8, 4], strides = [1, 1]} : vector<8x8xf32> to vector<8x4xf32>
    %13 = tpu.concatenate %11, %12 in 1 : vector<8x4xf32>, vector<8x4xf32> -> vector<8x8xf32>
    %c0_10 = arith.constant 0 : index
    %c0_11 = arith.constant 0 : index
    %14 = vector.load %arg7[%c0_10, %c0_11] : memref<8x8xf32, #tpu.memory_space<vmem>>, vector<8x8xf32>
    %15 = arith.mulf %13, %14 : vector<8x8xf32>
    %16 = arith.addf %10, %15 : vector<8x8xf32>
    %17 = arith.truncf %16 : vector<8x8xf32> to vector<8x8xbf16>
    %c0_12 = arith.constant 0 : index
    %c0_13 = arith.constant 0 : index
    %18 = vector.load %arg8[%c0_12, %c0_13] : memref<8x8xf32, #tpu.memory_space<vmem>>, vector<8x8xf32>
    %19 = arith.mulf %8, %18 : vector<8x8xf32>
    %20 = vector.extract_strided_slice %8 {offsets = [0, 4], sizes = [8, 4], strides = [1, 1]} : vector<8x8xf32> to vector<8x4xf32>
    %21 = vector.extract_strided_slice %8 {offsets = [0, 0], sizes = [8, 4], strides = [1, 1]} : vector<8x8xf32> to vector<8x4xf32>
    %22 = tpu.concatenate %20, %21 in 1 : vector<8x4xf32>, vector<8x4xf32> -> vector<8x8xf32>
    %c0_14 = arith.constant 0 : index
    %c0_15 = arith.constant 0 : index
    %23 = vector.load %arg9[%c0_14, %c0_15] : memref<8x8xf32, #tpu.memory_space<vmem>>, vector<8x8xf32>
    %24 = arith.mulf %22, %23 : vector<8x8xf32>
    %25 = arith.addf %19, %24 : vector<8x8xf32>
    %26 = arith.truncf %25 : vector<8x8xf32> to vector<8x8xbf16>
    %cst = arith.constant dense<0.000000e+00> : vector<8x8xf32>
    %27 = tpu.matmul %17, %26, %cst {dimension_numbers = #tpu.dot_dimension_numbers<[1], [1], [0], [0], [0, 0, 1, 0], [], []>} : vector<8x8xbf16>, vector<8x8xbf16>, vector<8x8xf32> -> vector<8x8xf32>
    %c0_16 = arith.constant 0 : index
    %c0_17 = arith.constant 0 : index
    %c0_18 = arith.constant 0 : index
    %28 = vector.load %arg10[%c0_16, %c0_17, %c0_18] : memref<1x1x8xf32, #tpu.memory_space<vmem>>, vector<1x1x8xf32>
    %29 = vector.shape_cast %28 : vector<1x1x8xf32> to vector<1x8xf32>
    %cst_19 = arith.constant 5.000000e-01 : f32
    %30 = vector.broadcast %cst_19 : f32 to vector<1x8xf32>
    %31 = arith.cmpf ogt, %29, %30 : vector<1x8xf32>
    %32 = tpu.iota {dimensions = array<i32: 0>} : vector<8x8xi32>
    %33 = tpu.iota {dimensions = array<i32: 1>} : vector<8x8xi32>
    %c8_i32 = arith.constant 8 : i32
    %34 = arith.muli %arg2, %c8_i32 : i32
    %35 = vector.broadcast %34 : i32 to vector<8x8xi32>
    %36 = arith.addi %33, %35 : vector<8x8xi32>
    %37 = arith.cmpi sge, %32, %36 : vector<8x8xi32>
    %38 = vector.broadcast %31 : vector<1x8xi1> to vector<8x8xi1>
    %39 = arith.andi %38, %37 : vector<8x8xi1>
    %cst_20 = arith.constant -1.000000e+30 : f32
    %40 = vector.broadcast %cst_20 : f32 to vector<8x8xf32>
    %41 = arith.select %39, %27, %40 : vector<8x8xi1>, vector<8x8xf32>
    %c0_21 = arith.constant 0 : index
    %c0_22 = arith.constant 0 : index
    %42 = vector.load %arg12[%c0_21, %c0_22] : memref<8x1xf32, #tpu.memory_space<vmem>>, vector<8x1xf32>
    %cst_23 = arith.constant dense<0xFF800000> : vector<8xf32>
    %43 = vector.multi_reduction <maximumf>, %41, %cst_23 [1] : vector<8x8xf32> to vector<8xf32>
    %44 = vector.shape_cast %43 : vector<8xf32> to vector<8x1xf32>
    %45 = arith.maximumf %42, %44 : vector<8x1xf32>
    %46 = arith.subf %42, %45 : vector<8x1xf32>
    %47 = math.exp %46 : vector<8x1xf32>
    %48 = vector.broadcast %45 : vector<8x1xf32> to vector<8x8xf32>
    %49 = arith.subf %41, %48 : vector<8x8xf32>
    %50 = math.exp %49 : vector<8x8xf32>
    %c0_24 = arith.constant 0 : index
    %c0_25 = arith.constant 0 : index
    %51 = vector.load %arg13[%c0_24, %c0_25] : memref<8x1xf32, #tpu.memory_space<vmem>>, vector<8x1xf32>
    %52 = arith.mulf %47, %51 : vector<8x1xf32>
    %cst_26 = arith.constant dense<0.000000e+00> : vector<8xf32>
    %53 = vector.multi_reduction <add>, %50, %cst_26 [1] : vector<8x8xf32> to vector<8xf32>
    %54 = vector.shape_cast %53 : vector<8xf32> to vector<8x1xf32>
    %55 = arith.addf %52, %54 : vector<8x1xf32>
    %c0_27 = arith.constant 0 : index
    %c0_28 = arith.constant 0 : index
    %56 = vector.load %arg13[%c0_27, %c0_28] : memref<8x1xf32, #tpu.memory_space<vmem>>, vector<8x1xf32>
    tpu.vector_store %arg13[%c0_27, %c0_28], %55 {strides = array<i32>} : memref<8x1xf32, #tpu.memory_space<vmem>>, vector<8x1xf32>,
    %c0_29 = arith.constant 0 : index
    %c0_30 = arith.constant 0 : index
    %57 = vector.load %arg14[%c0_29, %c0_30] : memref<8x8xf32, #tpu.memory_space<vmem>>, vector<8x8xf32>
    %58 = vector.broadcast %47 : vector<8x1xf32> to vector<8x8xf32>
    %59 = arith.mulf %58, %57 : vector<8x8xf32>
    %60 = arith.truncf %50 : vector<8x8xf32> to vector<8x8xbf16>
    %c0_31 = arith.constant 0 : index
    %c0_32 = arith.constant 0 : index
    %c0_33 = arith.constant 0 : index
    %c0_34 = arith.constant 0 : index
    %61 = vector.load %arg5[%c0_31, %c0_32, %c0_33, %c0_34] : memref<1x1x8x8xbf16, #tpu.memory_space<vmem>>, vector<1x1x8x8xbf16>
    %62 = vector.shape_cast %61 : vector<1x1x8x8xbf16> to vector<8x8xbf16>
    %cst_35 = arith.constant dense<0.000000e+00> : vector<8x8xf32>
    %63 = tpu.matmul %60, %62, %cst_35 {dimension_numbers = #tpu.dot_dimension_numbers<[1], [0], [0], [1], [0, 0, 1, 1], [], []>} : vector<8x8xbf16>, vector<8x8xbf16>, vector<8x8xf32> -> vector<8x8xf32>
    %64 = arith.addf %59, %63 : vector<8x8xf32>
    %c0_36 = arith.constant 0 : index
    %c0_37 = arith.constant 0 : index
    %65 = vector.load %arg14[%c0_36, %c0_37] : memref<8x8xf32, #tpu.memory_space<vmem>>, vector<8x8xf32>
    tpu.vector_store %arg14[%c0_36, %c0_37], %64 {strides = array<i32>} : memref<8x8xf32, #tpu.memory_space<vmem>>, vector<8x8xf32>,
    %c0_38 = arith.constant 0 : index
    %c0_39 = arith.constant 0 : index
    %66 = vector.load %arg12[%c0_38, %c0_39] : memref<8x1xf32, #tpu.memory_space<vmem>>, vector<8x1xf32>
    tpu.vector_store %arg12[%c0_38, %c0_39], %45 {strides = array<i32>} : memref<8x1xf32, #tpu.memory_space<vmem>>, vector<8x1xf32>,
    %c0_i32_40 = arith.constant 0 : i32
    %67 = arith.cmpi eq, %arg2, %c0_i32_40 : i32
    %68 = arith.extui %67 : i1 to i32
    %c0_i32_41 = arith.constant 0 : i32
    %69 = arith.cmpi ne, %68, %c0_i32_41 : i32
    scf.if %69 {
      %c0_42 = arith.constant 0 : index
      %c0_43 = arith.constant 0 : index
      %70 = vector.load %arg14[%c0_42, %c0_43] : memref<8x8xf32, #tpu.memory_space<vmem>>, vector<8x8xf32>
      %c0_44 = arith.constant 0 : index
      %c0_45 = arith.constant 0 : index
      %71 = vector.load %arg13[%c0_44, %c0_45] : memref<8x1xf32, #tpu.memory_space<vmem>>, vector<8x1xf32>
      %72 = tpu.reciprocal %71 {approx = true} : vector<8x1xf32> -> vector<8x1xf32>
      %73 = vector.broadcast %72 : vector<8x1xf32> to vector<8x8xf32>
      %74 = arith.mulf %70, %73 : vector<8x8xf32>
      %75 = arith.truncf %74 : vector<8x8xf32> to vector<8x8xbf16>
      %c0_46 = arith.constant 0 : index
      %c0_47 = arith.constant 0 : index
      %c0_48 = arith.constant 0 : index
      %c0_49 = arith.constant 0 : index
      %76 = vector.load %arg11[%c0_46, %c0_47, %c0_48, %c0_49] : memref<1x1x8x8xbf16, #tpu.memory_space<vmem>>, vector<1x1x8x8xbf16>
      %77 = vector.shape_cast %76 : vector<1x1x8x8xbf16> to vector<8x8xbf16>
      %78 = vector.shape_cast %75 : vector<8x8xbf16> to vector<1x1x8x8xbf16>
      tpu.vector_store %arg11[%c0_46, %c0_47, %c0_48, %c0_49], %78 {strides = array<i32>} : memref<1x1x8x8xbf16, #tpu.memory_space<vmem>>, vector<1x1x8x8xbf16>,
    } else {
    }
    return
  }
  func.func @transform_0(%arg0: i32, %arg1: i32, %arg2: i32) -> (i32, i32, i32, i32) {
    %c0_i32 = arith.constant 0 : i32
    %c0_i32_0 = arith.constant 0 : i32
    %c0_i32_1 = arith.constant 0 : i32
    return %arg0, %arg1, %c0_i32, %c0_i32_0 : i32, i32, i32, i32
  }
  func.func @transform_1(%arg0: i32, %arg1: i32, %arg2: i32) -> (i32, i32, i32, i32) {
    %c0_i32 = arith.constant 0 : i32
    %c0_i32_0 = arith.constant 0 : i32
    return %arg0, %arg1, %arg2, %c0_i32 : i32, i32, i32, i32
  }
  func.func @transform_2(%arg0: i32, %arg1: i32, %arg2: i32) -> (i32, i32, i32, i32) {
    %c0_i32 = arith.constant 0 : i32
    %c0_i32_0 = arith.constant 0 : i32
    return %arg0, %arg1, %arg2, %c0_i32 : i32, i32, i32, i32
  }
  func.func @transform_3(%arg0: i32, %arg1: i32, %arg2: i32) -> (i32, i32) {
    %c0_i32 = arith.constant 0 : i32
    %c0_i32_0 = arith.constant 0 : i32
    %c0_i32_1 = arith.constant 0 : i32
    return %c0_i32, %c0_i32_0 : i32, i32
  }
  func.func @transform_4(%arg0: i32, %arg1: i32, %arg2: i32) -> (i32, i32) {
    %c0_i32 = arith.constant 0 : i32
    %c0_i32_0 = arith.constant 0 : i32
    %c0_i32_1 = arith.constant 0 : i32
    return %c0_i32, %c0_i32_0 : i32, i32
  }
  func.func @transform_5(%arg0: i32, %arg1: i32, %arg2: i32) -> (i32, i32) {
    %c0_i32 = arith.constant 0 : i32
    %c0_i32_0 = arith.constant 0 : i32
    return %arg2, %c0_i32 : i32, i32
  }
  func.func @transform_6(%arg0: i32, %arg1: i32, %arg2: i32) -> (i32, i32) {
    %c0_i32 = arith.constant 0 : i32
    %c0_i32_0 = arith.constant 0 : i32
    return %arg2, %c0_i32 : i32, i32
  }
  func.func @transform_7(%arg0: i32, %arg1: i32, %arg2: i32) -> (i32, i32, i32) {
    %c0_i32 = arith.constant 0 : i32
    %c0_i32_0 = arith.constant 0 : i32
    return %arg0, %c0_i32, %arg2 : i32, i32, i32
  }
  func.func @transform_8(%arg0: i32, %arg1: i32, %arg2: i32) -> (i32, i32, i32, i32) {
    %c0_i32 = arith.constant 0 : i32
    %c0_i32_0 = arith.constant 0 : i32
    %c0_i32_1 = arith.constant 0 : i32
    return %arg0, %arg1, %c0_i32, %c0_i32_0 : i32, i32, i32, i32
  }
}

module attributes {stable_mosaic.version = 11 : i64} {
  func.func @out_res_kernel(%arg0: i32, %arg1: memref<16x32xbf16, #tpu.memory_space<vmem>>, %arg2: memref<32x32xbf16, #tpu.memory_space<vmem>>, %arg3: memref<1x32xf32, #tpu.memory_space<vmem>>, %arg4: memref<1x32xf32, #tpu.memory_space<vmem>>, %arg5: memref<16x32xf32, #tpu.memory_space<vmem>>, %arg6: memref<16x32xf32, #tpu.memory_space<vmem>>) attributes {dimension_semantics = [#tpu.dimension_semantics<parallel>], iteration_bounds = array<i64: 1>, scalar_prefetch = 0 : i64, scratch_operands = 0 : i64, tpu.core_type = #tpu.core_type<tc>, window_params = [{transform_indices = @transform_0, window_bounds = array<i64: 16, 32>}, {pipeline_mode = #tpu.pipeline_mode<synchronous>, transform_indices = @transform_1, window_bounds = array<i64: 32, 32>}, {pipeline_mode = #tpu.pipeline_mode<synchronous>, transform_indices = @transform_2, window_bounds = array<i64: 1, 32>}, {pipeline_mode = #tpu.pipeline_mode<synchronous>, transform_indices = @transform_3, window_bounds = array<i64: 1, 32>}, {transform_indices = @transform_4, window_bounds = array<i64: 16, 32>}, {transform_indices = @transform_5, window_bounds = array<i64: 16, 32>}]} {
    %c0 = arith.constant 0 : index
    %c0_0 = arith.constant 0 : index
    %0 = vector.load %arg1[%c0, %c0_0] : memref<16x32xbf16, #tpu.memory_space<vmem>>, vector<16x32xbf16>
    %c0_1 = arith.constant 0 : index
    %c0_2 = arith.constant 0 : index
    %1 = vector.load %arg2[%c0_1, %c0_2] : memref<32x32xbf16, #tpu.memory_space<vmem>>, vector<32x32xbf16>
    %cst = arith.constant dense<0.000000e+00> : vector<16x32xf32>
    %2 = tpu.matmul %0, %1, %cst {dimension_numbers = #tpu.dot_dimension_numbers<[1], [0], [0], [1], [0, 0, 1, 1], [], []>} : vector<16x32xbf16>, vector<32x32xbf16>, vector<16x32xf32> -> vector<16x32xf32>
    %c0_3 = arith.constant 0 : index
    %c0_4 = arith.constant 0 : index
    %3 = vector.load %arg3[%c0_3, %c0_4] : memref<1x32xf32, #tpu.memory_space<vmem>>, vector<1x32xf32>
    %4 = vector.broadcast %3 : vector<1x32xf32> to vector<16x32xf32>
    %5 = arith.addf %2, %4 : vector<16x32xf32>
    %c0_5 = arith.constant 0 : index
    %c0_6 = arith.constant 0 : index
    %6 = vector.load %arg5[%c0_5, %c0_6] : memref<16x32xf32, #tpu.memory_space<vmem>>, vector<16x32xf32>
    %c0_7 = arith.constant 0 : index
    %c0_8 = arith.constant 0 : index
    %7 = vector.load %arg4[%c0_7, %c0_8] : memref<1x32xf32, #tpu.memory_space<vmem>>, vector<1x32xf32>
    %8 = vector.broadcast %7 : vector<1x32xf32> to vector<16x32xf32>
    %9 = arith.mulf %8, %5 : vector<16x32xf32>
    %10 = arith.addf %6, %9 : vector<16x32xf32>
    %c0_9 = arith.constant 0 : index
    %c0_10 = arith.constant 0 : index
    %11 = vector.load %arg6[%c0_9, %c0_10] : memref<16x32xf32, #tpu.memory_space<vmem>>, vector<16x32xf32>
    tpu.vector_store %arg6[%c0_9, %c0_10], %10 {strides = array<i32>} : memref<16x32xf32, #tpu.memory_space<vmem>>, vector<16x32xf32>,
    return
  }
  func.func @transform_0(%arg0: i32) -> (i32, i32) {
    %c0_i32 = arith.constant 0 : i32
    %c0_i32_0 = arith.constant 0 : i32
    return %arg0, %c0_i32 : i32, i32
  }
  func.func @transform_1(%arg0: i32) -> (i32, i32) {
    %c0_i32 = arith.constant 0 : i32
    %c0_i32_0 = arith.constant 0 : i32
    %c0_i32_1 = arith.constant 0 : i32
    return %c0_i32, %c0_i32_0 : i32, i32
  }
  func.func @transform_2(%arg0: i32) -> (i32, i32) {
    %c0_i32 = arith.constant 0 : i32
    %c0_i32_0 = arith.constant 0 : i32
    %c0_i32_1 = arith.constant 0 : i32
    return %c0_i32, %c0_i32_0 : i32, i32
  }
  func.func @transform_3(%arg0: i32) -> (i32, i32) {
    %c0_i32 = arith.constant 0 : i32
    %c0_i32_0 = arith.constant 0 : i32
    %c0_i32_1 = arith.constant 0 : i32
    return %c0_i32, %c0_i32_0 : i32, i32
  }
  func.func @transform_4(%arg0: i32) -> (i32, i32) {
    %c0_i32 = arith.constant 0 : i32
    %c0_i32_0 = arith.constant 0 : i32
    return %arg0, %c0_i32 : i32, i32
  }
  func.func @transform_5(%arg0: i32) -> (i32, i32) {
    %c0_i32 = arith.constant 0 : i32
    %c0_i32_0 = arith.constant 0 : i32
    return %arg0, %c0_i32 : i32, i32
  }
}

module attributes {stable_mosaic.version = 11 : i64} {
  func.func @norm_linear_kernel(%arg0: i32, %arg1: i32, %arg2: memref<16x32xf32, #tpu.memory_space<vmem>>, %arg3: memref<1x32xf32, #tpu.memory_space<vmem>>, %arg4: memref<32x32xbf16, #tpu.memory_space<vmem>>, %arg5: memref<1x32xf32, #tpu.memory_space<vmem>>, %arg6: memref<16x32xbf16, #tpu.memory_space<vmem>>) attributes {dimension_semantics = [#tpu.dimension_semantics<parallel>, #tpu.dimension_semantics<parallel>], iteration_bounds = array<i64: 1, 1>, scalar_prefetch = 0 : i64, scratch_operands = 0 : i64, tpu.core_type = #tpu.core_type<tc>, window_params = [{transform_indices = @transform_0, window_bounds = array<i64: 16, 32>}, {pipeline_mode = #tpu.pipeline_mode<synchronous>, transform_indices = @transform_1, window_bounds = array<i64: 1, 32>}, {transform_indices = @transform_2, window_bounds = array<i64: 32, 32>}, {transform_indices = @transform_3, window_bounds = array<i64: 1, 32>}, {transform_indices = @transform_4, window_bounds = array<i64: 16, 32>}]} {
    %c0 = arith.constant 0 : index
    %c0_0 = arith.constant 0 : index
    %0 = vector.load %arg2[%c0, %c0_0] : memref<16x32xf32, #tpu.memory_space<vmem>>, vector<16x32xf32>
    %1 = arith.mulf %0, %0 : vector<16x32xf32>
    %cst = arith.constant dense<0.000000e+00> : vector<16xf32>
    %2 = vector.multi_reduction <add>, %1, %cst [1] : vector<16x32xf32> to vector<16xf32>
    %3 = vector.shape_cast %2 : vector<16xf32> to vector<16x1xf32>
    %cst_1 = arith.constant 3.200000e+01 : f32
    %4 = vector.broadcast %cst_1 : f32 to vector<16x1xf32>
    %5 = arith.divf %3, %4 : vector<16x1xf32>
    %cst_2 = arith.constant 9.99999997E-7 : f32
    %6 = vector.broadcast %cst_2 : f32 to vector<16x1xf32>
    %7 = arith.addf %5, %6 : vector<16x1xf32>
    %8 = math.rsqrt %7 : vector<16x1xf32>
    %9 = vector.broadcast %8 : vector<16x1xf32> to vector<16x32xf32>
    %10 = arith.mulf %0, %9 : vector<16x32xf32>
    %c0_3 = arith.constant 0 : index
    %c0_4 = arith.constant 0 : index
    %11 = vector.load %arg3[%c0_3, %c0_4] : memref<1x32xf32, #tpu.memory_space<vmem>>, vector<1x32xf32>
    %12 = vector.broadcast %11 : vector<1x32xf32> to vector<16x32xf32>
    %13 = arith.mulf %10, %12 : vector<16x32xf32>
    %14 = arith.truncf %13 : vector<16x32xf32> to vector<16x32xbf16>
    %c0_5 = arith.constant 0 : index
    %c0_6 = arith.constant 0 : index
    %15 = vector.load %arg4[%c0_5, %c0_6] : memref<32x32xbf16, #tpu.memory_space<vmem>>, vector<32x32xbf16>
    %cst_7 = arith.constant dense<0.000000e+00> : vector<16x32xf32>
    %16 = tpu.matmul %14, %15, %cst_7 {dimension_numbers = #tpu.dot_dimension_numbers<[1], [0], [0], [1], [0, 0, 1, 1], [], []>} : vector<16x32xbf16>, vector<32x32xbf16>, vector<16x32xf32> -> vector<16x32xf32>
    %c0_8 = arith.constant 0 : index
    %c0_9 = arith.constant 0 : index
    %17 = vector.load %arg5[%c0_8, %c0_9] : memref<1x32xf32, #tpu.memory_space<vmem>>, vector<1x32xf32>
    %18 = vector.broadcast %17 : vector<1x32xf32> to vector<16x32xf32>
    %19 = arith.addf %16, %18 : vector<16x32xf32>
    %20 = arith.truncf %19 : vector<16x32xf32> to vector<16x32xbf16>
    %c0_10 = arith.constant 0 : index
    %c0_11 = arith.constant 0 : index
    %21 = vector.load %arg6[%c0_10, %c0_11] : memref<16x32xbf16, #tpu.memory_space<vmem>>, vector<16x32xbf16>
    tpu.vector_store %arg6[%c0_10, %c0_11], %20 {strides = array<i32>} : memref<16x32xbf16, #tpu.memory_space<vmem>>, vector<16x32xbf16>,
    return
  }
  func.func @transform_0(%arg0: i32, %arg1: i32) -> (i32, i32) {
    %c0_i32 = arith.constant 0 : i32
    %c0_i32_0 = arith.constant 0 : i32
    return %arg1, %c0_i32 : i32, i32
  }
  func.func @transform_1(%arg0: i32, %arg1: i32) -> (i32, i32) {
    %c0_i32 = arith.constant 0 : i32
    %c0_i32_0 = arith.constant 0 : i32
    %c0_i32_1 = arith.constant 0 : i32
    return %c0_i32, %c0_i32_0 : i32, i32
  }
  func.func @transform_2(%arg0: i32, %arg1: i32) -> (i32, i32) {
    %c0_i32 = arith.constant 0 : i32
    %c0_i32_0 = arith.constant 0 : i32
    return %c0_i32, %arg0 : i32, i32
  }
  func.func @transform_3(%arg0: i32, %arg1: i32) -> (i32, i32) {
    %c0_i32 = arith.constant 0 : i32
    %c0_i32_0 = arith.constant 0 : i32
    return %c0_i32, %arg0 : i32, i32
  }
  func.func @transform_4(%arg0: i32, %arg1: i32) -> (i32, i32) {
    %c0_i32 = arith.constant 0 : i32
    return %arg1, %arg0 : i32, i32
  }
}

module attributes {stable_mosaic.version = 11 : i64} {
  func.func @flash_mha_kernel(%arg0: i32, %arg1: i32, %arg2: i32, %arg3: memref<1x1x8x8xbf16, #tpu.memory_space<vmem>>, %arg4: memref<1x1x8x8xbf16, #tpu.memory_space<vmem>>, %arg5: memref<1x1x8x8xbf16, #tpu.memory_space<vmem>>, %arg6: memref<8x8xf32, #tpu.memory_space<vmem>>, %arg7: memref<8x8xf32, #tpu.memory_space<vmem>>, %arg8: memref<8x8xf32, #tpu.memory_space<vmem>>, %arg9: memref<8x8xf32, #tpu.memory_space<vmem>>, %arg10: memref<1x1x8xf32, #tpu.memory_space<vmem>>, %arg11: memref<1x1x8x8xbf16, #tpu.memory_space<vmem>>, %arg12: memref<8x1xf32, #tpu.memory_space<vmem>>, %arg13: memref<8x1xf32, #tpu.memory_space<vmem>>, %arg14: memref<8x8xf32, #tpu.memory_space<vmem>>) attributes {dimension_semantics = [#tpu.dimension_semantics<parallel>, #tpu.dimension_semantics<parallel>, #tpu.dimension_semantics<arbitrary>], iteration_bounds = array<i64: 2, 4, 1>, scalar_prefetch = 0 : i64, scratch_operands = 3 : i64, tpu.core_type = #tpu.core_type<tc>, window_params = [{transform_indices = @transform_0, window_bounds = array<i64: 1, 1, 8, 8>}, {transform_indices = @transform_1, window_bounds = array<i64: 1, 1, 8, 8>}, {transform_indices = @transform_2, window_bounds = array<i64: 1, 1, 8, 8>}, {pipeline_mode = #tpu.pipeline_mode<synchronous>, transform_indices = @transform_3, window_bounds = array<i64: 8, 8>}, {pipeline_mode = #tpu.pipeline_mode<synchronous>, transform_indices = @transform_4, window_bounds = array<i64: 8, 8>}, {transform_indices = @transform_5, window_bounds = array<i64: 8, 8>}, {transform_indices = @transform_6, window_bounds = array<i64: 8, 8>}, {transform_indices = @transform_7, window_bounds = array<i64: 1, 1, 8>}, {transform_indices = @transform_8, window_bounds = array<i64: 1, 1, 8, 8>}]} {
    %c0_i32 = arith.constant 0 : i32
    %0 = arith.cmpi eq, %arg2, %c0_i32 : i32
    %1 = arith.extui %0 : i1 to i32
    %c0_i32_0 = arith.constant 0 : i32
    %2 = arith.cmpi ne, %1, %c0_i32_0 : i32
    scf.if %2 {
      %cst_42 = arith.constant -1.000000e+30 : f32
      %64 = vector.broadcast %cst_42 : f32 to vector<8x1xf32>
      %c0_43 = arith.constant 0 : index
      %c0_44 = arith.constant 0 : index
      %65 = vector.load %arg12[%c0_43, %c0_44] : memref<8x1xf32, #tpu.memory_space<vmem>>, vector<8x1xf32>
      tpu.vector_store %arg12[%c0_43, %c0_44], %64 {strides = array<i32>} : memref<8x1xf32, #tpu.memory_space<vmem>>, vector<8x1xf32>,
      %cst_45 = arith.constant 0.000000e+00 : f32
      %66 = vector.broadcast %cst_45 : f32 to vector<8x1xf32>
      %c0_46 = arith.constant 0 : index
      %c0_47 = arith.constant 0 : index
      %67 = vector.load %arg13[%c0_46, %c0_47] : memref<8x1xf32, #tpu.memory_space<vmem>>, vector<8x1xf32>
      tpu.vector_store %arg13[%c0_46, %c0_47], %66 {strides = array<i32>} : memref<8x1xf32, #tpu.memory_space<vmem>>, vector<8x1xf32>,
      %cst_48 = arith.constant 0.000000e+00 : f32
      %68 = vector.broadcast %cst_48 : f32 to vector<8x8xf32>
      %c0_49 = arith.constant 0 : index
      %c0_50 = arith.constant 0 : index
      %69 = vector.load %arg14[%c0_49, %c0_50] : memref<8x8xf32, #tpu.memory_space<vmem>>, vector<8x8xf32>
      tpu.vector_store %arg14[%c0_49, %c0_50], %68 {strides = array<i32>} : memref<8x8xf32, #tpu.memory_space<vmem>>, vector<8x8xf32>,
    } else {
    }
    %c0 = arith.constant 0 : index
    %c0_1 = arith.constant 0 : index
    %c0_2 = arith.constant 0 : index
    %c0_3 = arith.constant 0 : index
    %3 = vector.load %arg3[%c0, %c0_1, %c0_2, %c0_3] : memref<1x1x8x8xbf16, #tpu.memory_space<vmem>>, vector<1x1x8x8xbf16>
    %4 = vector.shape_cast %3 : vector<1x1x8x8xbf16> to vector<8x8xbf16>
    %5 = arith.extf %4 : vector<8x8xbf16> to vector<8x8xf32>
    %c0_4 = arith.constant 0 : index
    %c0_5 = arith.constant 0 : index
    %c0_6 = arith.constant 0 : index
    %c0_7 = arith.constant 0 : index
    %6 = vector.load %arg4[%c0_4, %c0_5, %c0_6, %c0_7] : memref<1x1x8x8xbf16, #tpu.memory_space<vmem>>, vector<1x1x8x8xbf16>
    %7 = vector.shape_cast %6 : vector<1x1x8x8xbf16> to vector<8x8xbf16>
    %8 = arith.extf %7 : vector<8x8xbf16> to vector<8x8xf32>
    %c0_8 = arith.constant 0 : index
    %c0_9 = arith.constant 0 : index
    %9 = vector.load %arg6[%c0_8, %c0_9] : memref<8x8xf32, #tpu.memory_space<vmem>>, vector<8x8xf32>
    %10 = arith.mulf %5, %9 : vector<8x8xf32>
    %11 = vector.extract_strided_slice %5 {offsets = [0, 4], sizes = [8, 4], strides = [1, 1]} : vector<8x8xf32> to vector<8x4xf32>
    %12 = vector.extract_strided_slice %5 {offsets = [0, 0], sizes = [8, 4], strides = [1, 1]} : vector<8x8xf32> to vector<8x4xf32>
    %13 = tpu.concatenate %11, %12 in 1 : vector<8x4xf32>, vector<8x4xf32> -> vector<8x8xf32>
    %c0_10 = arith.constant 0 : index
    %c0_11 = arith.constant 0 : index
    %14 = vector.load %arg7[%c0_10, %c0_11] : memref<8x8xf32, #tpu.memory_space<vmem>>, vector<8x8xf32>
    %15 = arith.mulf %13, %14 : vector<8x8xf32>
    %16 = arith.addf %10, %15 : vector<8x8xf32>
    %17 = arith.truncf %16 : vector<8x8xf32> to vector<8x8xbf16>
    %c0_12 = arith.constant 0 : index
    %c0_13 = arith.constant 0 : index
    %18 = vector.load %arg8[%c0_12, %c0_13] : memref<8x8xf32, #tpu.memory_space<vmem>>, vector<8x8xf32>
    %19 = arith.mulf %8, %18 : vector<8x8xf32>
    %20 = vector.extract_strided_slice %8 {offsets = [0, 4], sizes = [8, 4], strides = [1, 1]} : vector<8x8xf32> to vector<8x4xf32>
    %21 = vector.extract_strided_slice %8 {offsets = [0, 0], sizes = [8, 4], strides = [1, 1]} : vector<8x8xf32> to vector<8x4xf32>
    %22 = tpu.concatenate %20, %21 in 1 : vector<8x4xf32>, vector<8x4xf32> -> vector<8x8xf32>
    %c0_14 = arith.constant 0 : index
    %c0_15 = arith.constant 0 : index
    %23 = vector.load %arg9[%c0_14, %c0_15] : memref<8x8xf32, #tpu.memory_space<vmem>>, vector<8x8xf32>
    %24 = arith.mulf %22, %23 : vector<8x8xf32>
    %25 = arith.addf %19, %24 : vector<8x8xf32>
    %26 = arith.truncf %25 : vector<8x8xf32> to vector<8x8xbf16>
    %cst = arith.constant dense<0.000000e+00> : vector<8x8xf32>
    %27 = tpu.matmul %17, %26, %cst {dimension_numbers = #tpu.dot_dimension_numbers<[1], [1], [0], [0], [0, 0, 1, 0], [], []>} : vector<8x8xbf16>, vector<8x8xbf16>, vector<8x8xf32> -> vector<8x8xf32>
    %c0_16 = arith.constant 0 : index
    %c0_17 = arith.constant 0 : index
    %c0_18 = arith.constant 0 : index
    %28 = vector.load %arg10[%c0_16, %c0_17, %c0_18] : memref<1x1x8xf32, #tpu.memory_space<vmem>>, vector<1x1x8xf32>
    %29 = vector.shape_cast %28 : vector<1x1x8xf32> to vector<1x8xf32>
    %cst_19 = arith.constant 5.000000e-01 : f32
    %30 = vector.broadcast %cst_19 : f32 to vector<1x8xf32>
    %31 = arith.cmpf ogt, %29, %30 : vector<1x8xf32>
    %cst_20 = arith.constant -1.000000e+30 : f32
    %32 = vector.shape_cast %31 : vector<1x8xi1> to vector<1x8xi1>
    %33 = vector.broadcast %32 : vector<1x8xi1> to vector<8x8xi1>
    %34 = vector.broadcast %cst_20 : f32 to vector<8x8xf32>
    %35 = arith.select %33, %27, %34 : vector<8x8xi1>, vector<8x8xf32>
    %c0_21 = arith.constant 0 : index
    %c0_22 = arith.constant 0 : index
    %36 = vector.load %arg12[%c0_21, %c0_22] : memref<8x1xf32, #tpu.memory_space<vmem>>, vector<8x1xf32>
    %cst_23 = arith.constant dense<0xFF800000> : vector<8xf32>
    %37 = vector.multi_reduction <maximumf>, %35, %cst_23 [1] : vector<8x8xf32> to vector<8xf32>
    %38 = vector.shape_cast %37 : vector<8xf32> to vector<8x1xf32>
    %39 = arith.maximumf %36, %38 : vector<8x1xf32>
    %40 = arith.subf %36, %39 : vector<8x1xf32>
    %41 = math.exp %40 : vector<8x1xf32>
    %42 = vector.broadcast %39 : vector<8x1xf32> to vector<8x8xf32>
    %43 = arith.subf %35, %42 : vector<8x8xf32>
    %44 = math.exp %43 : vector<8x8xf32>
    %c0_24 = arith.constant 0 : index
    %c0_25 = arith.constant 0 : index
    %45 = vector.load %arg13[%c0_24, %c0_25] : memref<8x1xf32, #tpu.memory_space<vmem>>, vector<8x1xf32>
    %46 = arith.mulf %41, %45 : vector<8x1xf32>
    %cst_26 = arith.constant dense<0.000000e+00> : vector<8xf32>
    %47 = vector.multi_reduction <add>, %44, %cst_26 [1] : vector<8x8xf32> to vector<8xf32>
    %48 = vector.shape_cast %47 : vector<8xf32> to vector<8x1xf32>
    %49 = arith.addf %46, %48 : vector<8x1xf32>
    %c0_27 = arith.constant 0 : index
    %c0_28 = arith.constant 0 : index
    %50 = vector.load %arg13[%c0_27, %c0_28] : memref<8x1xf32, #tpu.memory_space<vmem>>, vector<8x1xf32>
    tpu.vector_store %arg13[%c0_27, %c0_28], %49 {strides = array<i32>} : memref<8x1xf32, #tpu.memory_space<vmem>>, vector<8x1xf32>,
    %c0_29 = arith.constant 0 : index
    %c0_30 = arith.constant 0 : index
    %51 = vector.load %arg14[%c0_29, %c0_30] : memref<8x8xf32, #tpu.memory_space<vmem>>, vector<8x8xf32>
    %52 = vector.broadcast %41 : vector<8x1xf32> to vector<8x8xf32>
    %53 = arith.mulf %52, %51 : vector<8x8xf32>
    %54 = arith.truncf %44 : vector<8x8xf32> to vector<8x8xbf16>
    %c0_31 = arith.constant 0 : index
    %c0_32 = arith.constant 0 : index
    %c0_33 = arith.constant 0 : index
    %c0_34 = arith.constant 0 : index
    %55 = vector.load %arg5[%c0_31, %c0_32, %c0_33, %c0_34] : memref<1x1x8x8xbf16, #tpu.memory_space<vmem>>, vector<1x1x8x8xbf16>
    %56 = vector.shape_cast %55 : vector<1x1x8x8xbf16> to vector<8x8xbf16>
    %cst_35 = arith.constant dense<0.000000e+00> : vector<8x8xf32>
    %57 = tpu.matmul %54, %56, %cst_35 {dimension_numbers = #tpu.dot_dimension_numbers<[1], [0], [0], [1], [0, 0, 1, 1], [], []>} : vector<8x8xbf16>, vector<8x8xbf16>, vector<8x8xf32> -> vector<8x8xf32>
    %58 = arith.addf %53, %57 : vector<8x8xf32>
    %c0_36 = arith.constant 0 : index
    %c0_37 = arith.constant 0 : index
    %59 = vector.load %arg14[%c0_36, %c0_37] : memref<8x8xf32, #tpu.memory_space<vmem>>, vector<8x8xf32>
    tpu.vector_store %arg14[%c0_36, %c0_37], %58 {strides = array<i32>} : memref<8x8xf32, #tpu.memory_space<vmem>>, vector<8x8xf32>,
    %c0_38 = arith.constant 0 : index
    %c0_39 = arith.constant 0 : index
    %60 = vector.load %arg12[%c0_38, %c0_39] : memref<8x1xf32, #tpu.memory_space<vmem>>, vector<8x1xf32>
    tpu.vector_store %arg12[%c0_38, %c0_39], %39 {strides = array<i32>} : memref<8x1xf32, #tpu.memory_space<vmem>>, vector<8x1xf32>,
    %c0_i32_40 = arith.constant 0 : i32
    %61 = arith.cmpi eq, %arg2, %c0_i32_40 : i32
    %62 = arith.extui %61 : i1 to i32
    %c0_i32_41 = arith.constant 0 : i32
    %63 = arith.cmpi ne, %62, %c0_i32_41 : i32
    scf.if %63 {
      %c0_42 = arith.constant 0 : index
      %c0_43 = arith.constant 0 : index
      %64 = vector.load %arg14[%c0_42, %c0_43] : memref<8x8xf32, #tpu.memory_space<vmem>>, vector<8x8xf32>
      %c0_44 = arith.constant 0 : index
      %c0_45 = arith.constant 0 : index
      %65 = vector.load %arg13[%c0_44, %c0_45] : memref<8x1xf32, #tpu.memory_space<vmem>>, vector<8x1xf32>
      %66 = tpu.reciprocal %65 {approx = true} : vector<8x1xf32> -> vector<8x1xf32>
      %67 = vector.broadcast %66 : vector<8x1xf32> to vector<8x8xf32>
      %68 = arith.mulf %64, %67 : vector<8x8xf32>
      %69 = arith.truncf %68 : vector<8x8xf32> to vector<8x8xbf16>
      %c0_46 = arith.constant 0 : index
      %c0_47 = arith.constant 0 : index
      %c0_48 = arith.constant 0 : index
      %c0_49 = arith.constant 0 : index
      %70 = vector.load %arg11[%c0_46, %c0_47, %c0_48, %c0_49] : memref<1x1x8x8xbf16, #tpu.memory_space<vmem>>, vector<1x1x8x8xbf16>
      %71 = vector.shape_cast %70 : vector<1x1x8x8xbf16> to vector<8x8xbf16>
      %72 = vector.shape_cast %69 : vector<8x8xbf16> to vector<1x1x8x8xbf16>
      tpu.vector_store %arg11[%c0_46, %c0_47, %c0_48, %c0_49], %72 {strides = array<i32>} : memref<1x1x8x8xbf16, #tpu.memory_space<vmem>>, vector<1x1x8x8xbf16>,
    } else {
    }
    return
  }
  func.func @transform_0(%arg0: i32, %arg1: i32, %arg2: i32) -> (i32, i32, i32, i32) {
    %c0_i32 = arith.constant 0 : i32
    %c0_i32_0 = arith.constant 0 : i32
    %c0_i32_1 = arith.constant 0 : i32
    return %arg0, %arg1, %c0_i32, %c0_i32_0 : i32, i32, i32, i32
  }
  func.func @transform_1(%arg0: i32, %arg1: i32, %arg2: i32) -> (i32, i32, i32, i32) {
    %c0_i32 = arith.constant 0 : i32
    %c0_i32_0 = arith.constant 0 : i32
    return %arg0, %arg1, %arg2, %c0_i32 : i32, i32, i32, i32
  }
  func.func @transform_2(%arg0: i32, %arg1: i32, %arg2: i32) -> (i32, i32, i32, i32) {
    %c0_i32 = arith.constant 0 : i32
    %c0_i32_0 = arith.constant 0 : i32
    return %arg0, %arg1, %arg2, %c0_i32 : i32, i32, i32, i32
  }
  func.func @transform_3(%arg0: i32, %arg1: i32, %arg2: i32) -> (i32, i32) {
    %c0_i32 = arith.constant 0 : i32
    %c0_i32_0 = arith.constant 0 : i32
    %c0_i32_1 = arith.constant 0 : i32
    return %c0_i32, %c0_i32_0 : i32, i32
  }
  func.func @transform_4(%arg0: i32, %arg1: i32, %arg2: i32) -> (i32, i32) {
    %c0_i32 = arith.constant 0 : i32
    %c0_i32_0 = arith.constant 0 : i32
    %c0_i32_1 = arith.constant 0 : i32
    return %c0_i32, %c0_i32_0 : i32, i32
  }
  func.func @transform_5(%arg0: i32, %arg1: i32, %arg2: i32) -> (i32, i32) {
    %c0_i32 = arith.constant 0 : i32
    %c0_i32_0 = arith.constant 0 : i32
    return %arg2, %c0_i32 : i32, i32
  }
  func.func @transform_6(%arg0: i32, %arg1: i32, %arg2: i32) -> (i32, i32) {
    %c0_i32 = arith.constant 0 : i32
    %c0_i32_0 = arith.constant 0 : i32
    return %arg2, %c0_i32 : i32, i32
  }
  func.func @transform_7(%arg0: i32, %arg1: i32, %arg2: i32) -> (i32, i32, i32) {
    %c0_i32 = arith.constant 0 : i32
    %c0_i32_0 = arith.constant 0 : i32
    return %arg0, %c0_i32, %arg2 : i32, i32, i32
  }
  func.func @transform_8(%arg0: i32, %arg1: i32, %arg2: i32) -> (i32, i32, i32, i32) {
    %c0_i32 = arith.constant 0 : i32
    %c0_i32_0 = arith.constant 0 : i32
    %c0_i32_1 = arith.constant 0 : i32
    return %arg0, %arg1, %c0_i32, %c0_i32_0 : i32, i32, i32, i32
  }
}

module attributes {stable_mosaic.version = 11 : i64} {
  func.func @norm_kv_kernel(%arg0: i32, %arg1: memref<16x32xf32, #tpu.memory_space<vmem>>, %arg2: memref<1x32xf32, #tpu.memory_space<vmem>>, %arg3: memref<32x64xbf16, #tpu.memory_space<vmem>>, %arg4: memref<1x64xf32, #tpu.memory_space<vmem>>, %arg5: memref<16x32xbf16, #tpu.memory_space<vmem>>, %arg6: memref<16x32xbf16, #tpu.memory_space<vmem>>) attributes {dimension_semantics = [#tpu.dimension_semantics<parallel>], iteration_bounds = array<i64: 1>, scalar_prefetch = 0 : i64, scratch_operands = 0 : i64, tpu.core_type = #tpu.core_type<tc>, window_params = [{transform_indices = @transform_0, window_bounds = array<i64: 16, 32>}, {pipeline_mode = #tpu.pipeline_mode<synchronous>, transform_indices = @transform_1, window_bounds = array<i64: 1, 32>}, {pipeline_mode = #tpu.pipeline_mode<synchronous>, transform_indices = @transform_2, window_bounds = array<i64: 32, 64>}, {pipeline_mode = #tpu.pipeline_mode<synchronous>, transform_indices = @transform_3, window_bounds = array<i64: 1, 64>}, {transform_indices = @transform_4, window_bounds = array<i64: 16, 32>}, {transform_indices = @transform_5, window_bounds = array<i64: 16, 32>}]} {
    %c0 = arith.constant 0 : index
    %c0_0 = arith.constant 0 : index
    %0 = vector.load %arg1[%c0, %c0_0] : memref<16x32xf32, #tpu.memory_space<vmem>>, vector<16x32xf32>
    %1 = arith.mulf %0, %0 : vector<16x32xf32>
    %cst = arith.constant dense<0.000000e+00> : vector<16xf32>
    %2 = vector.multi_reduction <add>, %1, %cst [1] : vector<16x32xf32> to vector<16xf32>
    %3 = vector.shape_cast %2 : vector<16xf32> to vector<16x1xf32>
    %cst_1 = arith.constant 3.200000e+01 : f32
    %4 = vector.broadcast %cst_1 : f32 to vector<16x1xf32>
    %5 = arith.divf %3, %4 : vector<16x1xf32>
    %cst_2 = arith.constant 9.99999997E-7 : f32
    %6 = vector.broadcast %cst_2 : f32 to vector<16x1xf32>
    %7 = arith.addf %5, %6 : vector<16x1xf32>
    %8 = math.rsqrt %7 : vector<16x1xf32>
    %9 = vector.broadcast %8 : vector<16x1xf32> to vector<16x32xf32>
    %10 = arith.mulf %0, %9 : vector<16x32xf32>
    %c0_3 = arith.constant 0 : index
    %c0_4 = arith.constant 0 : index
    %11 = vector.load %arg2[%c0_3, %c0_4] : memref<1x32xf32, #tpu.memory_space<vmem>>, vector<1x32xf32>
    %12 = vector.broadcast %11 : vector<1x32xf32> to vector<16x32xf32>
    %13 = arith.mulf %10, %12 : vector<16x32xf32>
    %14 = arith.truncf %13 : vector<16x32xf32> to vector<16x32xbf16>
    %c0_5 = arith.constant 0 : index
    %c0_6 = arith.constant 0 : index
    %15 = vector.load %arg3[%c0_5, %c0_6] : memref<32x64xbf16, #tpu.memory_space<vmem>>, vector<32x64xbf16>
    %cst_7 = arith.constant dense<0.000000e+00> : vector<16x64xf32>
    %16 = tpu.matmul %14, %15, %cst_7 {dimension_numbers = #tpu.dot_dimension_numbers<[1], [0], [0], [1], [0, 0, 1, 1], [], []>} : vector<16x32xbf16>, vector<32x64xbf16>, vector<16x64xf32> -> vector<16x64xf32>
    %c0_8 = arith.constant 0 : index
    %c0_9 = arith.constant 0 : index
    %17 = vector.load %arg4[%c0_8, %c0_9] : memref<1x64xf32, #tpu.memory_space<vmem>>, vector<1x64xf32>
    %18 = vector.broadcast %17 : vector<1x64xf32> to vector<16x64xf32>
    %19 = arith.addf %16, %18 : vector<16x64xf32>
    %20 = vector.extract_strided_slice %19 {offsets = [0, 0], sizes = [16, 32], strides = [1, 1]} : vector<16x64xf32> to vector<16x32xf32>
    %21 = arith.truncf %20 : vector<16x32xf32> to vector<16x32xbf16>
    %c0_10 = arith.constant 0 : index
    %c0_11 = arith.constant 0 : index
    %22 = vector.load %arg5[%c0_10, %c0_11] : memref<16x32xbf16, #tpu.memory_space<vmem>>, vector<16x32xbf16>
    tpu.vector_store %arg5[%c0_10, %c0_11], %21 {strides = array<i32>} : memref<16x32xbf16, #tpu.memory_space<vmem>>, vector<16x32xbf16>,
    %23 = vector.extract_strided_slice %19 {offsets = [0, 32], sizes = [16, 32], strides = [1, 1]} : vector<16x64xf32> to vector<16x32xf32>
    %24 = arith.truncf %23 : vector<16x32xf32> to vector<16x32xbf16>
    %c0_12 = arith.constant 0 : index
    %c0_13 = arith.constant 0 : index
    %25 = vector.load %arg6[%c0_12, %c0_13] : memref<16x32xbf16, #tpu.memory_space<vmem>>, vector<16x32xbf16>
    tpu.vector_store %arg6[%c0_12, %c0_13], %24 {strides = array<i32>} : memref<16x32xbf16, #tpu.memory_space<vmem>>, vector<16x32xbf16>,
    return
  }
  func.func @transform_0(%arg0: i32) -> (i32, i32) {
    %c0_i32 = arith.constant 0 : i32
    %c0_i32_0 = arith.constant 0 : i32
    return %arg0, %c0_i32 : i32, i32
  }
  func.func @transform_1(%arg0: i32) -> (i32, i32) {
    %c0_i32 = arith.constant 0 : i32
    %c0_i32_0 = arith.constant 0 : i32
    %c0_i32_1 = arith.constant 0 : i32
    return %c0_i32, %c0_i32_0 : i32, i32
  }
  func.func @transform_2(%arg0: i32) -> (i32, i32) {
    %c0_i32 = arith.constant 0 : i32
    %c0_i32_0 = arith.constant 0 : i32
    %c0_i32_1 = arith.constant 0 : i32
    return %c0_i32, %c0_i32_0 : i32, i32
  }
  func.func @transform_3(%arg0: i32) -> (i32, i32) {
    %c0_i32 = arith.constant 0 : i32
    %c0_i32_0 = arith.constant 0 : i32
    %c0_i32_1 = arith.constant 0 : i32
    return %c0_i32, %c0_i32_0 : i32, i32
  }
  func.func @transform_4(%arg0: i32) -> (i32, i32) {
    %c0_i32 = arith.constant 0 : i32
    %c0_i32_0 = arith.constant 0 : i32
    return %arg0, %c0_i32 : i32, i32
  }
  func.func @transform_5(%arg0: i32) -> (i32, i32) {
    %c0_i32 = arith.constant 0 : i32
    %c0_i32_0 = arith.constant 0 : i32
    return %arg0, %c0_i32 : i32, i32
  }
}

module attributes {stable_mosaic.version = 11 : i64} {
  func.func @ffn_res_kernel(%arg0: i32, %arg1: i32, %arg2: memref<16x32xf32, #tpu.memory_space<vmem>>, %arg3: memref<1x32xf32, #tpu.memory_space<vmem>>, %arg4: memref<32x64xbf16, #tpu.memory_space<vmem>>, %arg5: memref<1x64xf32, #tpu.memory_space<vmem>>, %arg6: memref<32x64xbf16, #tpu.memory_space<vmem>>, %arg7: memref<1x64xf32, #tpu.memory_space<vmem>>, %arg8: memref<64x32xbf16, #tpu.memory_space<vmem>>, %arg9: memref<1x32xf32, #tpu.memory_space<vmem>>, %arg10: memref<1x32xf32, #tpu.memory_space<vmem>>, %arg11: memref<16x32xf32, #tpu.memory_space<vmem>>, %arg12: memref<16x32xf32, #tpu.memory_space<vmem>>) attributes {dimension_semantics = [#tpu.dimension_semantics<parallel>, #tpu.dimension_semantics<arbitrary>], iteration_bounds = array<i64: 1, 1>, scalar_prefetch = 0 : i64, scratch_operands = 1 : i64, tpu.core_type = #tpu.core_type<tc>, window_params = [{transform_indices = @transform_0, window_bounds = array<i64: 16, 32>}, {pipeline_mode = #tpu.pipeline_mode<synchronous>, transform_indices = @transform_1, window_bounds = array<i64: 1, 32>}, {transform_indices = @transform_2, window_bounds = array<i64: 32, 64>}, {transform_indices = @transform_3, window_bounds = array<i64: 1, 64>}, {transform_indices = @transform_4, window_bounds = array<i64: 32, 64>}, {transform_indices = @transform_5, window_bounds = array<i64: 1, 64>}, {transform_indices = @transform_6, window_bounds = array<i64: 64, 32>}, {pipeline_mode = #tpu.pipeline_mode<synchronous>, transform_indices = @transform_7, window_bounds = array<i64: 1, 32>}, {pipeline_mode = #tpu.pipeline_mode<synchronous>, transform_indices = @transform_8, window_bounds = array<i64: 1, 32>}, {transform_indices = @transform_9, window_bounds = array<i64: 16, 32>}]} {
    %c0_i32 = arith.constant 0 : i32
    %0 = arith.cmpi eq, %arg1, %c0_i32 : i32
    %1 = arith.extui %0 : i1 to i32
    %c0_i32_0 = arith.constant 0 : i32
    %2 = arith.cmpi ne, %1, %c0_i32_0 : i32
    scf.if %2 {
      %cst_26 = arith.constant 0.000000e+00 : f32
      %43 = vector.broadcast %cst_26 : f32 to vector<16x32xf32>
      %c0_27 = arith.constant 0 : index
      %c0_28 = arith.constant 0 : index
      %44 = vector.load %arg12[%c0_27, %c0_28] : memref<16x32xf32, #tpu.memory_space<vmem>>, vector<16x32xf32>
      tpu.vector_store %arg12[%c0_27, %c0_28], %43 {strides = array<i32>} : memref<16x32xf32, #tpu.memory_space<vmem>>, vector<16x32xf32>,
    } else {
    }
    %c0 = arith.constant 0 : index
    %c0_1 = arith.constant 0 : index
    %3 = vector.load %arg2[%c0, %c0_1] : memref<16x32xf32, #tpu.memory_space<vmem>>, vector<16x32xf32>
    %4 = arith.mulf %3, %3 : vector<16x32xf32>
    %cst = arith.constant dense<0.000000e+00> : vector<16xf32>
    %5 = vector.multi_reduction <add>, %4, %cst [1] : vector<16x32xf32> to vector<16xf32>
    %6 = vector.shape_cast %5 : vector<16xf32> to vector<16x1xf32>
    %cst_2 = arith.constant 3.200000e+01 : f32
    %7 = vector.broadcast %cst_2 : f32 to vector<16x1xf32>
    %8 = arith.divf %6, %7 : vector<16x1xf32>
    %cst_3 = arith.constant 9.99999997E-7 : f32
    %9 = vector.broadcast %cst_3 : f32 to vector<16x1xf32>
    %10 = arith.addf %8, %9 : vector<16x1xf32>
    %11 = math.rsqrt %10 : vector<16x1xf32>
    %12 = vector.broadcast %11 : vector<16x1xf32> to vector<16x32xf32>
    %13 = arith.mulf %3, %12 : vector<16x32xf32>
    %c0_4 = arith.constant 0 : index
    %c0_5 = arith.constant 0 : index
    %14 = vector.load %arg3[%c0_4, %c0_5] : memref<1x32xf32, #tpu.memory_space<vmem>>, vector<1x32xf32>
    %15 = vector.broadcast %14 : vector<1x32xf32> to vector<16x32xf32>
    %16 = arith.mulf %13, %15 : vector<16x32xf32>
    %17 = arith.truncf %16 : vector<16x32xf32> to vector<16x32xbf16>
    %c0_6 = arith.constant 0 : index
    %c0_7 = arith.constant 0 : index
    %18 = vector.load %arg4[%c0_6, %c0_7] : memref<32x64xbf16, #tpu.memory_space<vmem>>, vector<32x64xbf16>
    %cst_8 = arith.constant dense<0.000000e+00> : vector<16x64xf32>
    %19 = tpu.matmul %17, %18, %cst_8 {dimension_numbers = #tpu.dot_dimension_numbers<[1], [0], [0], [1], [0, 0, 1, 1], [], []>} : vector<16x32xbf16>, vector<32x64xbf16>, vector<16x64xf32> -> vector<16x64xf32>
    %c0_9 = arith.constant 0 : index
    %c0_10 = arith.constant 0 : index
    %20 = vector.load %arg5[%c0_9, %c0_10] : memref<1x64xf32, #tpu.memory_space<vmem>>, vector<1x64xf32>
    %21 = vector.broadcast %20 : vector<1x64xf32> to vector<16x64xf32>
    %22 = arith.addf %19, %21 : vector<16x64xf32>
    %c0_11 = arith.constant 0 : index
    %c0_12 = arith.constant 0 : index
    %23 = vector.load %arg6[%c0_11, %c0_12] : memref<32x64xbf16, #tpu.memory_space<vmem>>, vector<32x64xbf16>
    %cst_13 = arith.constant dense<0.000000e+00> : vector<16x64xf32>
    %24 = tpu.matmul %17, %23, %cst_13 {dimension_numbers = #tpu.dot_dimension_numbers<[1], [0], [0], [1], [0, 0, 1, 1], [], []>} : vector<16x32xbf16>, vector<32x64xbf16>, vector<16x64xf32> -> vector<16x64xf32>
    %c0_14 = arith.constant 0 : index
    %c0_15 = arith.constant 0 : index
    %25 = vector.load %arg7[%c0_14, %c0_15] : memref<1x64xf32, #tpu.memory_space<vmem>>, vector<1x64xf32>
    %26 = vector.broadcast %25 : vector<1x64xf32> to vector<16x64xf32>
    %27 = arith.addf %24, %26 : vector<16x64xf32>
    %28 = arith.negf %27 : vector<16x64xf32>
    %29 = math.exp %28 : vector<16x64xf32>
    %cst_16 = arith.constant 1.000000e+00 : f32
    %30 = vector.broadcast %cst_16 : f32 to vector<16x64xf32>
    %31 = arith.addf %30, %29 : vector<16x64xf32>
    %32 = arith.divf %30, %31 : vector<16x64xf32>
    %33 = arith.mulf %22, %32 : vector<16x64xf32>
    %34 = arith.truncf %33 : vector<16x64xf32> to vector<16x64xbf16>
    %c0_17 = arith.constant 0 : index
    %c0_18 = arith.constant 0 : index
    %35 = vector.load %arg12[%c0_17, %c0_18] : memref<16x32xf32, #tpu.memory_space<vmem>>, vector<16x32xf32>
    %c0_19 = arith.constant 0 : index
    %c0_20 = arith.constant 0 : index
    %36 = vector.load %arg8[%c0_19, %c0_20] : memref<64x32xbf16, #tpu.memory_space<vmem>>, vector<64x32xbf16>
    %cst_21 = arith.constant dense<0.000000e+00> : vector<16x32xf32>
    %37 = tpu.matmul %34, %36, %cst_21 {dimension_numbers = #tpu.dot_dimension_numbers<[1], [0], [0], [1], [0, 0, 1, 1], [], []>} : vector<16x64xbf16>, vector<64x32xbf16>, vector<16x32xf32> -> vector<16x32xf32>
    %38 = arith.addf %35, %37 : vector<16x32xf32>
    %c0_22 = arith.constant 0 : index
    %c0_23 = arith.constant 0 : index
    %39 = vector.load %arg12[%c0_22, %c0_23] : memref<16x32xf32, #tpu.memory_space<vmem>>, vector<16x32xf32>
    tpu.vector_store %arg12[%c0_22, %c0_23], %38 {strides = array<i32>} : memref<16x32xf32, #tpu.memory_space<vmem>>, vector<16x32xf32>,
    %c0_i32_24 = arith.constant 0 : i32
    %40 = arith.cmpi eq, %arg1, %c0_i32_24 : i32
    %41 = arith.extui %40 : i1 to i32
    %c0_i32_25 = arith.constant 0 : i32
    %42 = arith.cmpi ne, %41, %c0_i32_25 : i32
    scf.if %42 {
      %c0_26 = arith.constant 0 : index
      %c0_27 = arith.constant 0 : index
      %43 = vector.load %arg10[%c0_26, %c0_27] : memref<1x32xf32, #tpu.memory_space<vmem>>, vector<1x32xf32>
      %c0_28 = arith.constant 0 : index
      %c0_29 = arith.constant 0 : index
      %44 = vector.load %arg12[%c0_28, %c0_29] : memref<16x32xf32, #tpu.memory_space<vmem>>, vector<16x32xf32>
      %c0_30 = arith.constant 0 : index
      %c0_31 = arith.constant 0 : index
      %45 = vector.load %arg9[%c0_30, %c0_31] : memref<1x32xf32, #tpu.memory_space<vmem>>, vector<1x32xf32>
      %46 = vector.broadcast %45 : vector<1x32xf32> to vector<16x32xf32>
      %47 = arith.addf %44, %46 : vector<16x32xf32>
      %48 = vector.broadcast %43 : vector<1x32xf32> to vector<16x32xf32>
      %49 = arith.mulf %48, %47 : vector<16x32xf32>
      %50 = arith.addf %3, %49 : vector<16x32xf32>
      %c0_32 = arith.constant 0 : index
      %c0_33 = arith.constant 0 : index
      %51 = vector.load %arg11[%c0_32, %c0_33] : memref<16x32xf32, #tpu.memory_space<vmem>>, vector<16x32xf32>
      tpu.vector_store %arg11[%c0_32, %c0_33], %50 {strides = array<i32>} : memref<16x32xf32, #tpu.memory_space<vmem>>, vector<16x32xf32>,
    } else {
    }
    return
  }
  func.func @transform_0(%arg0: i32, %arg1: i32) -> (i32, i32) {
    %c0_i32 = arith.constant 0 : i32
    %c0_i32_0 = arith.constant 0 : i32
    return %arg0, %c0_i32 : i32, i32
  }
  func.func @transform_1(%arg0: i32, %arg1: i32) -> (i32, i32) {
    %c0_i32 = arith.constant 0 : i32
    %c0_i32_0 = arith.constant 0 : i32
    %c0_i32_1 = arith.constant 0 : i32
    return %c0_i32, %c0_i32_0 : i32, i32
  }
  func.func @transform_2(%arg0: i32, %arg1: i32) -> (i32, i32) {
    %c0_i32 = arith.constant 0 : i32
    %c0_i32_0 = arith.constant 0 : i32
    return %c0_i32, %arg1 : i32, i32
  }
  func.func @transform_3(%arg0: i32, %arg1: i32) -> (i32, i32) {
    %c0_i32 = arith.constant 0 : i32
    %c0_i32_0 = arith.constant 0 : i32
    return %c0_i32, %arg1 : i32, i32
  }
  func.func @transform_4(%arg0: i32, %arg1: i32) -> (i32, i32) {
    %c0_i32 = arith.constant 0 : i32
    %c0_i32_0 = arith.constant 0 : i32
    return %c0_i32, %arg1 : i32, i32
  }
  func.func @transform_5(%arg0: i32, %arg1: i32) -> (i32, i32) {
    %c0_i32 = arith.constant 0 : i32
    %c0_i32_0 = arith.constant 0 : i32
    return %c0_i32, %arg1 : i32, i32
  }
  func.func @transform_6(%arg0: i32, %arg1: i32) -> (i32, i32) {
    %c0_i32 = arith.constant 0 : i32
    %c0_i32_0 = arith.constant 0 : i32
    return %arg1, %c0_i32 : i32, i32
  }
  func.func @transform_7(%arg0: i32, %arg1: i32) -> (i32, i32) {
    %c0_i32 = arith.constant 0 : i32
    %c0_i32_0 = arith.constant 0 : i32
    %c0_i32_1 = arith.constant 0 : i32
    return %c0_i32, %c0_i32_0 : i32, i32
  }
  func.func @transform_8(%arg0: i32, %arg1: i32) -> (i32, i32) {
    %c0_i32 = arith.constant 0 : i32
    %c0_i32_0 = arith.constant 0 : i32
    %c0_i32_1 = arith.constant 0 : i32
    return %c0_i32, %c0_i32_0 : i32, i32
  }
  func.func @transform_9(%arg0: i32, %arg1: i32) -> (i32, i32) {
    %c0_i32 = arith.constant 0 : i32
    %c0_i32_0 = arith.constant 0 : i32
    return %arg0, %c0_i32 : i32, i32
  }
}

module attributes {stable_mosaic.version = 11 : i64} {
  func.func @norm_linear_kernel(%arg0: i32, %arg1: i32, %arg2: memref<16x32xf32, #tpu.memory_space<vmem>>, %arg3: memref<1x32xf32, #tpu.memory_space<vmem>>, %arg4: memref<32x64xbf16, #tpu.memory_space<vmem>>, %arg5: memref<1x64xf32, #tpu.memory_space<vmem>>, %arg6: memref<16x64xf32, #tpu.memory_space<vmem>>) attributes {dimension_semantics = [#tpu.dimension_semantics<parallel>, #tpu.dimension_semantics<parallel>], iteration_bounds = array<i64: 1, 1>, scalar_prefetch = 0 : i64, scratch_operands = 0 : i64, tpu.core_type = #tpu.core_type<tc>, window_params = [{transform_indices = @transform_0, window_bounds = array<i64: 16, 32>}, {pipeline_mode = #tpu.pipeline_mode<synchronous>, transform_indices = @transform_1, window_bounds = array<i64: 1, 32>}, {transform_indices = @transform_2, window_bounds = array<i64: 32, 64>}, {transform_indices = @transform_3, window_bounds = array<i64: 1, 64>}, {transform_indices = @transform_4, window_bounds = array<i64: 16, 64>}]} {
    %c0 = arith.constant 0 : index
    %c0_0 = arith.constant 0 : index
    %0 = vector.load %arg2[%c0, %c0_0] : memref<16x32xf32, #tpu.memory_space<vmem>>, vector<16x32xf32>
    %1 = arith.mulf %0, %0 : vector<16x32xf32>
    %cst = arith.constant dense<0.000000e+00> : vector<16xf32>
    %2 = vector.multi_reduction <add>, %1, %cst [1] : vector<16x32xf32> to vector<16xf32>
    %3 = vector.shape_cast %2 : vector<16xf32> to vector<16x1xf32>
    %cst_1 = arith.constant 3.200000e+01 : f32
    %4 = vector.broadcast %cst_1 : f32 to vector<16x1xf32>
    %5 = arith.divf %3, %4 : vector<16x1xf32>
    %cst_2 = arith.constant 9.99999997E-7 : f32
    %6 = vector.broadcast %cst_2 : f32 to vector<16x1xf32>
    %7 = arith.addf %5, %6 : vector<16x1xf32>
    %8 = math.rsqrt %7 : vector<16x1xf32>
    %9 = vector.broadcast %8 : vector<16x1xf32> to vector<16x32xf32>
    %10 = arith.mulf %0, %9 : vector<16x32xf32>
    %c0_3 = arith.constant 0 : index
    %c0_4 = arith.constant 0 : index
    %11 = vector.load %arg3[%c0_3, %c0_4] : memref<1x32xf32, #tpu.memory_space<vmem>>, vector<1x32xf32>
    %12 = vector.broadcast %11 : vector<1x32xf32> to vector<16x32xf32>
    %13 = arith.mulf %10, %12 : vector<16x32xf32>
    %14 = arith.truncf %13 : vector<16x32xf32> to vector<16x32xbf16>
    %c0_5 = arith.constant 0 : index
    %c0_6 = arith.constant 0 : index
    %15 = vector.load %arg4[%c0_5, %c0_6] : memref<32x64xbf16, #tpu.memory_space<vmem>>, vector<32x64xbf16>
    %cst_7 = arith.constant dense<0.000000e+00> : vector<16x64xf32>
    %16 = tpu.matmul %14, %15, %cst_7 {dimension_numbers = #tpu.dot_dimension_numbers<[1], [0], [0], [1], [0, 0, 1, 1], [], []>} : vector<16x32xbf16>, vector<32x64xbf16>, vector<16x64xf32> -> vector<16x64xf32>
    %c0_8 = arith.constant 0 : index
    %c0_9 = arith.constant 0 : index
    %17 = vector.load %arg5[%c0_8, %c0_9] : memref<1x64xf32, #tpu.memory_space<vmem>>, vector<1x64xf32>
    %18 = vector.broadcast %17 : vector<1x64xf32> to vector<16x64xf32>
    %19 = arith.addf %16, %18 : vector<16x64xf32>
    %c0_10 = arith.constant 0 : index
    %c0_11 = arith.constant 0 : index
    %20 = vector.load %arg6[%c0_10, %c0_11] : memref<16x64xf32, #tpu.memory_space<vmem>>, vector<16x64xf32>
    tpu.vector_store %arg6[%c0_10, %c0_11], %19 {strides = array<i32>} : memref<16x64xf32, #tpu.memory_space<vmem>>, vector<16x64xf32>,
    return
  }
  func.func @transform_0(%arg0: i32, %arg1: i32) -> (i32, i32) {
    %c0_i32 = arith.constant 0 : i32
    %c0_i32_0 = arith.constant 0 : i32
    return %arg1, %c0_i32 : i32, i32
  }
  func.func @transform_1(%arg0: i32, %arg1: i32) -> (i32, i32) {
    %c0_i32 = arith.constant 0 : i32
    %c0_i32_0 = arith.constant 0 : i32
    %c0_i32_1 = arith.constant 0 : i32
    return %c0_i32, %c0_i32_0 : i32, i32
  }
  func.func @transform_2(%arg0: i32, %arg1: i32) -> (i32, i32) {
    %c0_i32 = arith.constant 0 : i32
    %c0_i32_0 = arith.constant 0 : i32
    return %c0_i32, %arg0 : i32, i32
  }
  func.func @transform_3(%arg0: i32, %arg1: i32) -> (i32, i32) {
    %c0_i32 = arith.constant 0 : i32
    %c0_i32_0 = arith.constant 0 : i32
    return %c0_i32, %arg0 : i32, i32
  }
  func.func @transform_4(%arg0: i32, %arg1: i32) -> (i32, i32) {
    %c0_i32 = arith.constant 0 : i32
    return %arg1, %arg0 : i32, i32
  }
}

</mosaic_0001>

<bundles_post_ra>
// kernel: transformer_forward.33
= control target key start
LH: loop header
LB: loop body
LE: loop exit
PB: predicated region body
PF: predicated region fallthrough
CT: control target
= control target key end

     0   :  { %vm25_vm0 = vcmask 261120   ;;  %v187_v6 = vmov 0.0   ;;  %vm188_vm1 = vmmov 0   ;;  %vm126_vm2 = vcmask 257024   ;;  %s190_s9 = smov 96   ;;  %s271_s0 = inlined_call_operand.vmem [shape: f32[16,32], index: 0, kind: input, shape index: {}]   ;;  %s272_s2 = inlined_call_operand.vmem [shape: bf16[32,96], index: 2, kind: input, shape index: {}]   ;;  %s273_s1 = inlined_call_operand.vmem [shape: f32[1,32], index: 1, kind: input, shape index: {}]   ;;  %s274_s3 = inlined_call_operand.vmem [shape: f32[1,96], index: 3, kind: input, shape index: {}]   ;;  %s275_s4 = inlined_call_operand.vmem [shape: bf16[16,32], index: 4, kind: output, shape index: {0}]   ;;  %s276_s6 = inlined_call_operand.vmem [shape: bf16[16,32], index: 6, kind: output, shape index: {2}]   ;;  %s277_s5 = inlined_call_operand.vmem [shape: bf16[16,32], index: 5, kind: output, shape index: {1}]  }
   0x1   :  { %v21_v0 = vld [vmem:[%s271_s0] sm:$0xff]  ;;  %v22_v1 = vld [vmem:[%s271_s0 + $0x8] sm:$0xff]  ;;  %169 = vmatprep.subr.bf16.mxu0 %v187_v6  ;;  %173 = vmatprep.mubr.msk.bf16.mxu0 %vm188_vm1, %v187_v6 }
   0x2   :  { %v23_v2 = vmul.f32 %v21_v0, %v21_v0  ;;  %v24_v3 = vmul.f32 %v22_v1, %v22_v1  ;;  %v181_v7 = vld [vmem:[%s272_s2 + $0x8] sm:$0xff]   ;;  %v182_v8 = vld [vmem:[%s272_s2] sm:$0xff]  }
   0x3   :  { %170 = vmatpush3.bf16.msra.mxu0 %v181_v7  ;;  %v157_v18 = vld [vmem:[%s273_s1] ss:$0 sm:$0xff]  ;;  %s189_s1 = smov 64  }
   0x4   :  { %v26_v4 = vsel %vm25_vm0, %v23_v2, 0.0  ;;  %v29_v5 = vsel %vm25_vm0, %v24_v3, 0.0  ;;  %171 = vmatprep.subr.bf16.mxu0 %v187_v6  ;;  %v158_v23 = vld [vmem:[%s274_s3] ss:$0 sm:$0xff] }
   0x5   :  { %27 = vadd.xlane.f32.xlu0 %v26_v4 }
   0x7   :  { %172 = vmatpush3.bf16.msra.mxu0 %v182_v8 }
   0x9   :  { %30 = vadd.xlane.f32.xlu0 %v29_v5 }
  0x8e   :  { %v28_v9 = vpop.xlane.xlu0 %27 }
  0x8f   :  { %v33_v10 = vmul.f32 0.03125, %v28_v9 }
  0x91   :  { %v35_v11 = vadd.f32 1e-06, %v33_v10 }
  0x92   :  { %v31_v12 = vpop.xlane.xlu0 %30 }
  0x93   :  { %183 = vrsqrt.f32 %v35_v11  ;;  %v34_v13 = vmul.f32 0.03125, %v31_v12 }
  0x95   :  { %v36_v14 = vadd.f32 1e-06, %v34_v13 }
  0x97   :  { %185 = vrsqrt.f32 %v36_v14 }
  0xa0   :  { %v184_v15 = vpop.eup %183 }
  0xa1   :  { %v39_v16 = vmul.f32 %v184_v15, %v21_v0 }
  0xa3   :  { %v48_v20 = vmul.f32 %v157_v18, %v39_v16 }
  0xa4   :  { %v186_v17 = vpop.eup %185 }
  0xa5   :  { %v40_v19 = vmul.f32 %v186_v17, %v22_v1 }
  0xa7   :  { %v49_v21 = vmul.f32 %v157_v18, %v40_v19 }
  0xa9   :  { %v50_v22 = vpack.c.bf16 %v49_v21, %v48_v20 }
  0xab   :  { %174 = vmatmul.mubr.msk.bf16.vlgmr.msra.gmra.mxu0 %vm25_vm0, %v50_v22 }
 0x16b   :  { %v111_v24 = vpop.f32.mrf.mxu0 }
 0x16c   :  { %v112_v25 = vadd.f32 %v158_v23, %v111_v24 }
 0x16d   :  { %v175_v26 = vpop.f32.mrf.mxu0 }
 0x16e   :  { %v164_v27 = vpack.c.bf16 %v112_v25, %v112_v25 }
 0x16f   :  { %v114_v28 = vpop.f32.mrf.mxu0 }
 0x170   :  { %127 = vst.msk [vmem:[%s275_s4] sm:$0xf] %vm126_vm2, %v164_v27  ;;  %v115_v29 = vadd.f32 %v158_v23, %v114_v28  ;;  %137 = vrot.lane.b32.xlu0 %v164_v27, %s189_s1  ;;  %129 = vrot.lane.b32.xlu1 %v164_v27, %s190_s9 }
 0x171   :  { %v176_v30 = vpop.f32.mrf.mxu0 }
 0x172   :  { %v165_v31 = vpack.c.bf16 %v115_v29, %v115_v29 }
 0x174   :  { %128 = vst.msk [vmem:[%s275_s4 + $0x4] sm:$0xf] %vm126_vm2, %v165_v31  ;;  %131 = vrot.lane.b32.xlu1 %v165_v31, %s190_s9 }
 0x178   :  { %139 = vrot.lane.b32.xlu1 %v165_v31, %s189_s1 }
 0x1e2   :  { %v138_v32 = vpop.permute.xlu0 %137  ;;  %v130_v33 = vpop.permute.xlu1 %129 }
 0x1e3   :  { %143 = vst.msk [vmem:[%s276_s6] sm:$0xf] %vm126_vm2, %v138_v32  ;;  %135 = vst.msk [vmem:[%s277_s5] sm:$0xf] %vm126_vm2, %v130_v33 }
 0x1e6   :  { %v132_v34 = vpop.permute.xlu1 %131 }
 0x1e7   :  { %136 = vst.msk [vmem:[%s277_s5 + $0x4] sm:$0xf] %vm126_vm2, %v132_v34 }
 0x1ea   :  { %v140_v35 = vpop.permute.xlu1 %139 }
 0x1eb   :  { %144 = vst.msk [vmem:[%s276_s6 + $0x4] sm:$0xf] %vm126_vm2, %v140_v35 }

// kernel: transformer_forward.34
= control target key start
LH: loop header
LB: loop body
LE: loop exit
PB: predicated region body
PF: predicated region fallthrough
CT: control target
= control target key end

     0   :  { %s1047_s27 = smov 0   ;;  %s1049_s28 = smov 0   ;;  %s1140_s0 = inlined_call_operand.vmem [shape: bf16[2,4,8,8], index: 0, kind: input, shape index: {}]   ;;  %s1141_s1 = inlined_call_operand.vmem [shape: bf16[2,4,8,8], index: 1, kind: input, shape index: {}]   ;;  %s1142_s2 = inlined_call_operand.vmem [shape: bf16[2,4,8,8], index: 2, kind: input, shape index: {}]   ;;  %s1143_s3 = inlined_call_operand.vmem [shape: f32[8,8], index: 3, kind: input, shape index: {}]   ;;  %s1144_s4 = inlined_call_operand.vmem [shape: f32[8,8], index: 4, kind: input, shape index: {}]   ;;  %s1145_s5 = inlined_call_operand.vmem [shape: f32[8,8], index: 5, kind: input, shape index: {}]   ;;  %s1146_s6 = inlined_call_operand.vmem [shape: f32[8,8], index: 6, kind: input, shape index: {}]   ;;  %s1147_s7 = inlined_call_operand.vmem [shape: f32[2,1,8], index: 7, kind: input, shape index: {}]   ;;  %s1148_s8 = inlined_call_operand.vmem [shape: bf16[2,4,8,8], index: 8, kind: output, shape index: {}]  }
   0x1   :  { %s1051_s29 = smov 0   ;;  %s1053_s30 = smov 0  }
   0x2   :  { %s1055_s9 = smov 0  }
   0x3 LB: > { %s33_s10 = sadd.s32 1, %s986_s29  ;;  %s37_s11 = sadd.s32 1, %s990_s30  ;;  %s994_s9 = sphi %s1055_s9, %s18_s9   ;;  %s990_s30 = sphi %s1053_s30, %s1152_s30   ;;  %s986_s29 = sphi %s1051_s29, %s1151_s29   ;;  %s982_s28 = sphi %s1049_s28, %s1150_s28   ;;  %s978_s27 = sphi %s1047_s27, %s1149_s27  }
   0x4   : > { %p35_p0 = scmp.ge.s32.totalorder %s33_s10, 4  ;;  %p873_p1 = scmp.ge.s32.totalorder %s994_s9, 1 }
   0x5   : > { %p359_p2 = scmp.lt.s32.totalorder %s994_s9, 9 }
   0x6   : > { %s1154_s10 = smov (%p35_p0, %s33_s10), 0  ;;  %s1156_s11 = smov (!%p35_p0, %s37_s11), %s990_s30 }
   0x7   : > { %p360_p3 = pnand %p873_p1, %p359_p2  ;;  %p39_p4 = scmp.ge.s32.totalorder %s1156_s11, 2 }
   0x8   : > { %p435_p5 = scmp.lt.s32.totalorder (!%p360_p3), %s982_s28, 1  ;;  %p437_p6 = scmp.lt.s32.totalorder (!%p360_p3), %s978_s27, 3 }
   0x9   : > { %s1158_s11 = smov (%p39_p4, %s1156_s11), 0  ;;  %363 = sbr.rel (%p360_p3) target bundleno = 925 (0x39d), region = 52 }
   0xa   : > { %s997_s21 = smov (!%p360_p3), 124   ;;  %s999_s22 = smov (!%p360_p3), 4  }
   0xe   : > { %s1160_s28 = smov (!%p435_p5, %s982_s28), 1  ;;  %s1162_s27 = smov (!%p437_p6, %s978_s27), 3  ;;  %vm495_vm0 = vcmask 64512   ;;  %v996_v2 = vmov 0.0   ;;  %vm998_vm1 = vmmov 0   ;;  %v516_v7 = vld [vmem:[%s1145_s5] sm:$0xff]  ;;  %v579_v28 = vlaneseq }
   0xf   : > { %s874_s12 = sshll.u32 %s1160_s28, 2  ;;  %890 = vmatprep.subr.bf16.mxu0 %v996_v2  ;;  %496 = vst.msk [vmem:[#allocation4] sm:$0xff] %vm495_vm0, %v996_v2  ;;  %896 = vmatprep.subr.bf16.mxu1 %v996_v2  ;;  %vm510_vm2 = vcmask 31744   ;;  %v526_v8 = vld [vmem:[%s1146_s6] sm:$0xff]  ;;  %s478_s18 = scalar_lea.vmem %s1147_s7, %s1160_s28  ;;  %v1000_v25 = vmov 0   ;;  %vm492_vm4 = vcmask 7168  }
  0x10   : > { %s440_s13 = sadd.s32 %s874_s12, %s1162_s27  ;;  %892 = vmatprep.mubr.msk.bf16.mxu0 %vm998_vm1, %v996_v2  ;;  %898 = vmatprep.mubr.msk.bf16.mxu1 %vm998_vm1, %v996_v2  ;;  %v501_v14 = vld [vmem:[%s1143_s3] sm:$0xff]  ;;  %v1001_v27 = vmov -1e+30   ;;  %494 = vst.msk [vmem:[#allocation3] sm:$0xff] %vm492_vm4, %v996_v2  ;;  %v580_v29 = vshrl.u32 %v579_v28, 7  ;;  %v582_v31 = vand.u32 127, %v579_v28 }
  0x11   : > { %s1080_s14 = sshll.u32 %s440_s13, 2  ;;  %v512_v15 = vld [vmem:[%s1144_s4] sm:$0xff]  ;;  %948 = vset.pattern.permute.xlu1 %v1000_v25  ;;  %949 = vset.pattern.permute.xlu0 %v1000_v25  ;;  %493 = vst.msk [vmem:[#allocation2] sm:$0xff] %vm492_vm4, %v1001_v27  ;;  %vm631_vm8 = vcmask 1043456   ;;  %vm691_vm9 = vcmask 60416  }
  0x12   : > { %s453_s17 = scalar_lea.vmem %s1141_s1, %s1080_s14  ;;  %s442_s20 = scalar_lea.vmem %s1140_s0, %s1080_s14  ;;  %v577_v24 = vld [vmem:[%s478_s18] sm:$0x1]  ;;  %v590_v30 = vsub.s32 0, %v580_v29  ;;  %vm586_vm5 = vcmp.ge.s32.totalorder %v580_v29, %v582_v31 }
  0x13   : > { %v499_v0 = vld [vmem:[%s453_s17] sm:$0xf]  ;;  %vm578_vm3 = vcmp.gt.f32.partialorder %v577_v24, 0.5  ;;  %s486_s23 = scalar_lea.vmem %s1148_s8, %s1080_s14 }
  0x14   : > { %v497_v1 = vld [vmem:[%s442_s20] sm:$0xf]  ;;  %v500_v3 = vunpack.c.l.bf16 %v499_v0  ;;  %v587_v26 = vsel %vm578_vm3, 1, %v1000_v25  ;;  %s464_s20 = scalar_lea.vmem %s1142_s2, %s1080_s14 }
  0x15   : > { %v498_v4 = vunpack.c.l.bf16 %v497_v1  ;;  %v591_v32 = vrot.slane %v587_v26, %v590_v30  ;;  %v627_v43 = vld [vmem:[%s464_s20] sm:$0xf] }
  0x16   : > { %519 = vrot.lane.b32.xlu0 %v500_v3, %s997_s21  ;;  %v517_v11 = vmul.f32 %v516_v7, %v500_v3  ;;  %v633_v45 = vsel %vm631_vm8, %v627_v43, 0  ;;  %v619_v59 = vld [vmem:[#allocation4] sm:$0xff] }
  0x17   : > { %504 = vrot.lane.b32.xlu1 %v498_v4, %s997_s21  ;;  %v502_v18 = vmul.f32 %v501_v14, %v498_v4  ;;  %vm592_vm6 = vcmp.eq.s32.totalorder %v591_v32, 1  ;;  %897 = vmatpush3.bf16.msra.mxu1 %v633_v45  ;;  %v611_v53 = vld [vmem:[#allocation3] sm:$0xff] }
  0x18   : > { %vm593_vm7 = vmand %vm592_vm6, %vm586_vm5  ;;  %v595_v39 = vld [vmem:[#allocation2] sm:$0xff] }
  0x1a   : > { %522 = vrot.lane.b32.xlu0 %v500_v3, %s999_s22 }
  0x1b   : > { %507 = vrot.lane.b32.xlu1 %v498_v4, %s999_s22 }
  0x88   : > { %v520_v5 = vpop.permute.xlu0 %519 }
  0x89   : > { %v505_v6 = vpop.permute.xlu1 %504 }
  0x8c   : > { %v523_v9 = vpop.permute.xlu0 %522 }
  0x8d   : > { %v508_v10 = vpop.permute.xlu1 %507  ;;  %v525_v12 = vsel %vm510_vm2, %v520_v5, %v523_v9 }
  0x8e   : > { %v527_v13 = vmul.f32 %v526_v8, %v525_v12  ;;  %v511_v16 = vsel %vm510_vm2, %v505_v6, %v508_v10 }
  0x8f   : > { %v513_v19 = vmul.f32 %v512_v15, %v511_v16 }
  0x90   : > { %v528_v17 = vadd.f32 %v527_v13, %v517_v11 }
  0x91   : > { %v514_v22 = vadd.f32 %v513_v19, %v502_v18 }
  0x92   : > { %v529_v20 = vpack.c.bf16 %v528_v17, %v528_v17 }
  0x93   : > { %v515_v23 = vpack.c.bf16 %v514_v22, %v514_v22 }
  0x94   : > { %v535_v21 = vsel %vm495_vm0, %v529_v20, 0 }
  0x95   : > { %891 = vmatpush3.bf16.xpose.msra.mxu0 %v535_v21 }
  0x9c   : > { %893 = vmatmul.mubr.msk.bf16.vlgmr.msra.gmra.mxu0 %vm495_vm0, %v515_v23 }
 0x15c   : > { %v571_v33 = vpop.f32.mrf.mxu0 }
 0x15d   : > { %v594_v34 = vsel %vm593_vm7, %v571_v33, -1e+30 }
 0x15e   : > { %v894_v35 = vpop.f32.mrf.mxu0  ;;  %v596_v36 = vsel %vm495_vm0, %v594_v34, -inf }
 0x15f   : > { %597 = vmax.xlane.f32.xlu0 %v596_v36 }
 0x160   : > { %v574_v37 = vpop.f32.mrf.mxu0 }
 0x162   : > { %v895_v38 = vpop.f32.mrf.mxu0 }
 0x1e8   : > { %v598_v40 = vpop.xlane.xlu0 %597 }
 0x1e9   : > { %v599_v41 = vmax.f32 %v595_v39, %v598_v40 }
 0x1eb   : > { %v600_v42 = vsub.f32 %v595_v39, %v599_v41  ;;  %677 = vst.msk [vmem:[#allocation2] sm:$0xff] %vm492_vm4, %v599_v41  ;;  %605 = vperm.xlu1 %948, %v599_v41  }
 0x1ed   : > { %v601_v44 = vmul.f32 1.442695, %v600_v42 }
 0x1ef   : > { %950 = vpow2.f32 %v601_v44 }
 0x1fc   : > { %v951_v46 = vpop.eup %950 }
 0x1fd   : > { %622 = vperm.xlu0 %949, %v951_v46   ;;  %v612_v54 = vmul.f32 %v951_v46, %v611_v53 }
 0x266   : > { %v606_v47 = vpop.permute.xlu1 %605 }
 0x267   : > { %v608_v48 = vsub.f32 %v594_v34, %v606_v47 }
 0x269   : > { %v609_v49 = vmul.f32 1.442695, %v608_v48 }
 0x26b   : > { %952 = vpow2.f32 %v609_v49 }
 0x278   : > { %v953_v50 = vpop.eup %952  ;;  %v623_v60 = vpop.permute.xlu0 %622 }
 0x279   : > { %v613_v51 = vsel %vm495_vm0, %v953_v50, 0.0  ;;  %v626_v52 = vpack.c.bf16 %v953_v50, %v953_v50  ;;  %v625_v61 = vmul.f32 %v623_v60, %v619_v59 }
 0x27a   : > { %614 = vadd.xlane.f32.xlu1 %v613_v51 }
 0x27b   : > { %899 = vmatmul.mubr.msk.bf16.vlgmr.msra.gmra.mxu1 %vm495_vm0, %v626_v52 }
 0x303   : > { %v615_v55 = vpop.xlane.xlu1 %614 }
 0x304   : > { %v616_v56 = vadd.f32 %v615_v55, %v612_v54 }
 0x306   : > { %618 = vst.msk [vmem:[#allocation3] sm:$0xff] %vm492_vm4, %v616_v56 }
 0x30d   : > { %v682_v57 = vld [vmem:[#allocation3] sm:$0xff] }
 0x30e   : > { %954 = vrcp.f32 %v682_v57 }
 0x31b   : > { %v955_v58 = vpop.eup %954 }
 0x31c   : > { %686 = vperm.xlu1 %948, %v955_v58  }
 0x33b   : > { %v669_v62 = vpop.f32.mrf.mxu1 }
 0x33c   : > { %v675_v63 = vadd.f32 %v669_v62, %v625_v61 }
 0x33d   : > { %v900_v0 = vpop.f32.mrf.mxu1 }
 0x33e   : > { %676 = vst.msk [vmem:[#allocation4] sm:$0xff] %vm495_vm0, %v675_v63 }
 0x33f   : > { %v672_v1 = vpop.f32.mrf.mxu1 }
 0x341   : > { %v901_v2 = vpop.f32.mrf.mxu1 }
 0x345   : > { %v681_v3 = vld [vmem:[#allocation4] sm:$0xff] }
 0x397   : > { %v687_v4 = vpop.permute.xlu1 %686 }
 0x398   : > { %v689_v5 = vmul.f32 %v687_v4, %v681_v3 }
 0x39a   : > { %v690_v6 = vpack.c.bf16 %v689_v5, %v689_v5 }
 0x39c   : > { %692 = vst.msk [vmem:[%s486_s23] sm:$0xf] %vm691_vm9, %v690_v6 }
 0x39d PF: > { %s18_s9 = sadd.s32 1, %s994_s9   ;;  %s1149_s27 = smov %s986_s29 }
 0x39e   : > { %p15_p7 = scmp.ge.s32.totalorder %s18_s9, 10   ;;  %s1150_s28 = smov %s990_s30 }
 0x39f   : > { %s1151_s29 = smov %s1154_s10  ;;  %s1152_s30 = smov %s1158_s11 }
 0x3a0   :  { %17 = sbr.rel (!%p15_p7) target bundleno = 3 (0x3), region = 105 }

// kernel: transformer_forward.35
= control target key start
LH: loop header
LB: loop body
LE: loop exit
PB: predicated region body
PF: predicated region fallthrough
CT: control target
= control target key end

     0   :  { %v137_v0 = vmov 0.0   ;;  %vm138_vm0 = vmmov 0   ;;  %vm51_vm1 = vcmask 261120   ;;  %s199_s1 = inlined_call_operand.vmem [shape: bf16[32,32], index: 1, kind: input, shape index: {}]   ;;  %s200_s0 = inlined_call_operand.vmem [shape: bf16[16,32], index: 0, kind: input, shape index: {}]   ;;  %s201_s2 = inlined_call_operand.vmem [shape: f32[1,32], index: 2, kind: input, shape index: {}]   ;;  %s202_s3 = inlined_call_operand.vmem [shape: f32[1,32], index: 3, kind: input, shape index: {}]   ;;  %s203_s4 = inlined_call_operand.vmem [shape: f32[16,32], index: 4, kind: input, shape index: {}]   ;;  %s204_s5 = inlined_call_operand.vmem [shape: f32[16,32], index: 5, kind: output, shape index: {}]  }
   0x1   :  { %124 = vmatprep.subr.bf16.mxu0 %v137_v0  ;;  %v134_v1 = vld [vmem:[%s199_s1 + $0x8] sm:$0xff]   ;;  %128 = vmatprep.mubr.msk.bf16.mxu0 %vm138_vm0, %v137_v0  ;;  %v135_v2 = vld [vmem:[%s199_s1] sm:$0xff]  }
   0x2   :  { %125 = vmatpush3.bf16.msra.mxu0 %v134_v1  ;;  %v136_v3 = vld [vmem:[%s200_s0] sm:$0xff]   ;;  %v97_v14 = vld [vmem:[%s203_s4 + $0x8] sm:$0xff] }
   0x3   :  { %126 = vmatprep.subr.bf16.mxu0 %v137_v0  ;;  %v115_v4 = vld [vmem:[%s201_s2] ss:$0 sm:$0xff] }
   0x4   :  { %v120_v6 = vld [vmem:[%s202_s3] ss:$0 sm:$0xff] }
   0x5   :  { %v96_v8 = vld [vmem:[%s203_s4] sm:$0xff] }
   0x6   :  { %127 = vmatpush3.bf16.msra.mxu0 %v135_v2 }
   0x9   :  { %129 = vmatmul.mubr.msk.bf16.vlgmr.msra.gmra.mxu0 %vm51_vm1, %v136_v3 }
  0xc9   :  { %v89_v5 = vpop.f32.mrf.mxu0 }
  0xca   :  { %v90_v7 = vadd.f32 %v115_v4, %v89_v5 }
  0xcb   :  { %v130_v9 = vpop.f32.mrf.mxu0 }
  0xcc   :  { %v105_v10 = vmul.f32 %v120_v6, %v90_v7 }
  0xcd   :  { %v92_v11 = vpop.f32.mrf.mxu0 }
  0xce   :  { %v107_v12 = vadd.f32 %v105_v10, %v96_v8  ;;  %v93_v13 = vadd.f32 %v115_v4, %v92_v11 }
  0xcf   :  { %v131_v15 = vpop.f32.mrf.mxu0 }
  0xd0   :  { %109 = vst.msk [vmem:[%s204_s5] sm:$0xff] %vm51_vm1, %v107_v12  ;;  %v106_v16 = vmul.f32 %v120_v6, %v93_v13 }
  0xd2   :  { %v108_v17 = vadd.f32 %v106_v16, %v97_v14 }
  0xd4   :  { %110 = vst.msk [vmem:[%s204_s5 + $0x8] sm:$0xff] %vm51_vm1, %v108_v17 }

// kernel: transformer_forward.36
= control target key start
LH: loop header
LB: loop body
LE: loop exit
PB: predicated region body
PF: predicated region fallthrough
CT: control target
= control target key end

     0   :  { %vm22_vm0 = vcmask 261120   ;;  %v158_v6 = vmov 0.0   ;;  %vm159_vm1 = vmmov 0   ;;  %vm123_vm2 = vcmask 257024   ;;  %s212_s0 = inlined_call_operand.vmem [shape: f32[16,32], index: 0, kind: input, shape index: {}]   ;;  %s213_s2 = inlined_call_operand.vmem [shape: bf16[32,32], index: 2, kind: input, shape index: {}]   ;;  %s214_s1 = inlined_call_operand.vmem [shape: f32[1,32], index: 1, kind: input, shape index: {}]   ;;  %s215_s3 = inlined_call_operand.vmem [shape: f32[1,32], index: 3, kind: input, shape index: {}]   ;;  %s216_s4 = inlined_call_operand.vmem [shape: bf16[16,32], index: 4, kind: output, shape index: {}]  }
   0x1   :  { %v18_v0 = vld [vmem:[%s212_s0] sm:$0xff]  ;;  %v19_v1 = vld [vmem:[%s212_s0 + $0x8] sm:$0xff]  ;;  %142 = vmatprep.subr.bf16.mxu0 %v158_v6  ;;  %146 = vmatprep.mubr.msk.bf16.mxu0 %vm159_vm1, %v158_v6 }
   0x2   :  { %v20_v2 = vmul.f32 %v18_v0, %v18_v0  ;;  %v21_v3 = vmul.f32 %v19_v1, %v19_v1  ;;  %v152_v7 = vld [vmem:[%s213_s2 + $0x8] sm:$0xff]   ;;  %v153_v8 = vld [vmem:[%s213_s2] sm:$0xff]  }
   0x3   :  { %143 = vmatpush3.bf16.msra.mxu0 %v152_v7  ;;  %v130_v18 = vld [vmem:[%s214_s1] ss:$0 sm:$0xff] }
   0x4   :  { %v23_v4 = vsel %vm22_vm0, %v20_v2, 0.0  ;;  %v26_v5 = vsel %vm22_vm0, %v21_v3, 0.0  ;;  %144 = vmatprep.subr.bf16.mxu0 %v158_v6  ;;  %v131_v23 = vld [vmem:[%s215_s3] ss:$0 sm:$0xff] }
   0x5   :  { %24 = vadd.xlane.f32.xlu0 %v23_v4 }
   0x7   :  { %145 = vmatpush3.bf16.msra.mxu0 %v153_v8 }
   0x9   :  { %27 = vadd.xlane.f32.xlu0 %v26_v5 }
  0x8e   :  { %v25_v9 = vpop.xlane.xlu0 %24 }
  0x8f   :  { %v30_v10 = vmul.f32 0.03125, %v25_v9 }
  0x91   :  { %v32_v11 = vadd.f32 1e-06, %v30_v10 }
  0x92   :  { %v28_v12 = vpop.xlane.xlu0 %27 }
  0x93   :  { %154 = vrsqrt.f32 %v32_v11  ;;  %v31_v13 = vmul.f32 0.03125, %v28_v12 }
  0x95   :  { %v33_v14 = vadd.f32 1e-06, %v31_v13 }
  0x97   :  { %156 = vrsqrt.f32 %v33_v14 }
  0xa0   :  { %v155_v15 = vpop.eup %154 }
  0xa1   :  { %v36_v16 = vmul.f32 %v155_v15, %v18_v0 }
  0xa3   :  { %v45_v20 = vmul.f32 %v130_v18, %v36_v16 }
  0xa4   :  { %v157_v17 = vpop.eup %156 }
  0xa5   :  { %v37_v19 = vmul.f32 %v157_v17, %v19_v1 }
  0xa7   :  { %v46_v21 = vmul.f32 %v130_v18, %v37_v19 }
  0xa9   :  { %v47_v22 = vpack.c.bf16 %v46_v21, %v45_v20 }
  0xab   :  { %147 = vmatmul.mubr.msk.bf16.vlgmr.msra.gmra.mxu0 %vm22_vm0, %v47_v22 }
 0x16b   :  { %v108_v24 = vpop.f32.mrf.mxu0 }
 0x16c   :  { %v109_v25 = vadd.f32 %v131_v23, %v108_v24 }
 0x16d   :  { %v148_v26 = vpop.f32.mrf.mxu0 }
 0x16e   :  { %v137_v27 = vpack.c.bf16 %v109_v25, %v109_v25 }
 0x16f   :  { %v111_v28 = vpop.f32.mrf.mxu0 }
 0x170   :  { %124 = vst.msk [vmem:[%s216_s4] sm:$0xf] %vm123_vm2, %v137_v27  ;;  %v112_v29 = vadd.f32 %v131_v23, %v111_v28 }
 0x171   :  { %v149_v30 = vpop.f32.mrf.mxu0 }
 0x172   :  { %v138_v31 = vpack.c.bf16 %v112_v29, %v112_v29 }
 0x174   :  { %125 = vst.msk [vmem:[%s216_s4 + $0x4] sm:$0xf] %vm123_vm2, %v138_v31 }

// kernel: transformer_forward.37
= control target key start
LH: loop header
LB: loop body
LE: loop exit
PB: predicated region body
PF: predicated region fallthrough
CT: control target
= control target key end

     0   :  { %vm24_vm0 = vcmask 261120   ;;  %v173_v6 = vmov 0.0   ;;  %vm174_vm1 = vmmov 0   ;;  %vm125_vm2 = vcmask 257024   ;;  %s243_s0 = inlined_call_operand.vmem [shape: f32[16,32], index: 0, kind: input, shape index: {}]   ;;  %s244_s2 = inlined_call_operand.vmem [shape: bf16[32,64], index: 2, kind: input, shape index: {}]   ;;  %s245_s1 = inlined_call_operand.vmem [shape: f32[1,32], index: 1, kind: input, shape index: {}]   ;;  %s246_s3 = inlined_call_operand.vmem [shape: f32[1,64], index: 3, kind: input, shape index: {}]   ;;  %s247_s4 = inlined_call_operand.vmem [shape: bf16[16,32], index: 4, kind: output, shape index: {0}]   ;;  %s248_s5 = inlined_call_operand.vmem [shape: bf16[16,32], index: 5, kind: output, shape index: {1}]  }
   0x1   :  { %v20_v0 = vld [vmem:[%s243_s0] sm:$0xff]  ;;  %v21_v1 = vld [vmem:[%s243_s0 + $0x8] sm:$0xff]  ;;  %156 = vmatprep.subr.bf16.mxu0 %v173_v6  ;;  %160 = vmatprep.mubr.msk.bf16.mxu0 %vm174_vm1, %v173_v6 }
   0x2   :  { %v22_v2 = vmul.f32 %v20_v0, %v20_v0  ;;  %v23_v3 = vmul.f32 %v21_v1, %v21_v1  ;;  %v167_v7 = vld [vmem:[%s244_s2 + $0x8] sm:$0xff]   ;;  %v168_v8 = vld [vmem:[%s244_s2] sm:$0xff]  }
   0x3   :  { %157 = vmatpush3.bf16.msra.mxu0 %v167_v7  ;;  %v144_v18 = vld [vmem:[%s245_s1] ss:$0 sm:$0xff]  ;;  %s175_s1 = smov 96  }
   0x4   :  { %v25_v4 = vsel %vm24_vm0, %v22_v2, 0.0  ;;  %v28_v5 = vsel %vm24_vm0, %v23_v3, 0.0  ;;  %158 = vmatprep.subr.bf16.mxu0 %v173_v6  ;;  %v145_v23 = vld [vmem:[%s246_s3] ss:$0 sm:$0xff] }
   0x5   :  { %26 = vadd.xlane.f32.xlu0 %v25_v4 }
   0x7   :  { %159 = vmatpush3.bf16.msra.mxu0 %v168_v8 }
   0x9   :  { %29 = vadd.xlane.f32.xlu0 %v28_v5 }
  0x8e   :  { %v27_v9 = vpop.xlane.xlu0 %26 }
  0x8f   :  { %v32_v10 = vmul.f32 0.03125, %v27_v9 }
  0x91   :  { %v34_v11 = vadd.f32 1e-06, %v32_v10 }
  0x92   :  { %v30_v12 = vpop.xlane.xlu0 %29 }
  0x93   :  { %169 = vrsqrt.f32 %v34_v11  ;;  %v33_v13 = vmul.f32 0.03125, %v30_v12 }
  0x95   :  { %v35_v14 = vadd.f32 1e-06, %v33_v13 }
  0x97   :  { %171 = vrsqrt.f32 %v35_v14 }
  0xa0   :  { %v170_v15 = vpop.eup %169 }
  0xa1   :  { %v38_v16 = vmul.f32 %v170_v15, %v20_v0 }
  0xa3   :  { %v47_v20 = vmul.f32 %v144_v18, %v38_v16 }
  0xa4   :  { %v172_v17 = vpop.eup %171 }
  0xa5   :  { %v39_v19 = vmul.f32 %v172_v17, %v21_v1 }
  0xa7   :  { %v48_v21 = vmul.f32 %v144_v18, %v39_v19 }
  0xa9   :  { %v49_v22 = vpack.c.bf16 %v48_v21, %v47_v20 }
  0xab   :  { %161 = vmatmul.mubr.msk.bf16.vlgmr.msra.gmra.mxu0 %vm24_vm0, %v49_v22 }
 0x16b   :  { %v110_v24 = vpop.f32.mrf.mxu0 }
 0x16c   :  { %v111_v25 = vadd.f32 %v145_v23, %v110_v24 }
 0x16d   :  { %v162_v26 = vpop.f32.mrf.mxu0 }
 0x16e   :  { %v151_v27 = vpack.c.bf16 %v111_v25, %v111_v25 }
 0x16f   :  { %v113_v28 = vpop.f32.mrf.mxu0 }
 0x170   :  { %126 = vst.msk [vmem:[%s247_s4] sm:$0xf] %vm125_vm2, %v151_v27  ;;  %v114_v29 = vadd.f32 %v145_v23, %v113_v28  ;;  %128 = vrot.lane.b32.xlu1 %v151_v27, %s175_s1 }
 0x171   :  { %v163_v30 = vpop.f32.mrf.mxu0 }
 0x172   :  { %v152_v31 = vpack.c.bf16 %v114_v29, %v114_v29 }
 0x174   :  { %127 = vst.msk [vmem:[%s247_s4 + $0x4] sm:$0xf] %vm125_vm2, %v152_v31  ;;  %130 = vrot.lane.b32.xlu1 %v152_v31, %s175_s1 }
 0x1e2   :  { %v129_v32 = vpop.permute.xlu1 %128 }
 0x1e3   :  { %134 = vst.msk [vmem:[%s248_s5] sm:$0xf] %vm125_vm2, %v129_v32 }
 0x1e6   :  { %v131_v33 = vpop.permute.xlu1 %130 }
 0x1e7   :  { %135 = vst.msk [vmem:[%s248_s5 + $0x4] sm:$0xf] %vm125_vm2, %v131_v33 }

// kernel: transformer_forward.26
= control target key start
LH: loop header
LB: loop body
LE: loop exit
PB: predicated region body
PF: predicated region fallthrough
CT: control target
= control target key end

     0   :  { %s1038_s27 = smov 0   ;;  %s1040_s28 = smov 0   ;;  %s1131_s0 = inlined_call_operand.vmem [shape: bf16[2,4,8,8], index: 0, kind: input, shape index: {}]   ;;  %s1132_s1 = inlined_call_operand.vmem [shape: bf16[2,4,8,8], index: 1, kind: input, shape index: {}]   ;;  %s1133_s2 = inlined_call_operand.vmem [shape: bf16[2,4,8,8], index: 2, kind: input, shape index: {}]   ;;  %s1134_s3 = inlined_call_operand.vmem [shape: f32[8,8], index: 3, kind: input, shape index: {}]   ;;  %s1135_s4 = inlined_call_operand.vmem [shape: f32[8,8], index: 4, kind: input, shape index: {}]   ;;  %s1136_s5 = inlined_call_operand.vmem [shape: f32[8,8], index: 5, kind: input, shape index: {}]   ;;  %s1137_s6 = inlined_call_operand.vmem [shape: f32[8,8], index: 6, kind: input, shape index: {}]   ;;  %s1138_s7 = inlined_call_operand.vmem [shape: f32[2,1,8], index: 7, kind: input, shape index: {}]   ;;  %s1139_s8 = inlined_call_operand.vmem [shape: bf16[2,4,8,8], index: 8, kind: output, shape index: {}]  }
   0x1   :  { %s1042_s29 = smov 0   ;;  %s1044_s30 = smov 0  }
   0x2   :  { %s1046_s9 = smov 0  }
   0x3 LB: > { %s33_s10 = sadd.s32 1, %s977_s29  ;;  %s37_s11 = sadd.s32 1, %s981_s30  ;;  %s985_s9 = sphi %s1046_s9, %s18_s9   ;;  %s981_s30 = sphi %s1044_s30, %s1143_s30   ;;  %s977_s29 = sphi %s1042_s29, %s1142_s29   ;;  %s973_s28 = sphi %s1040_s28, %s1141_s28   ;;  %s969_s27 = sphi %s1038_s27, %s1140_s27  }
   0x4   : > { %p35_p0 = scmp.ge.s32.totalorder %s33_s10, 4  ;;  %p864_p1 = scmp.ge.s32.totalorder %s985_s9, 1 }
   0x5   : > { %p359_p2 = scmp.lt.s32.totalorder %s985_s9, 9 }
   0x6   : > { %s1145_s10 = smov (%p35_p0, %s33_s10), 0  ;;  %s1147_s11 = smov (!%p35_p0, %s37_s11), %s981_s30 }
   0x7   : > { %p360_p3 = pnand %p864_p1, %p359_p2  ;;  %p39_p4 = scmp.ge.s32.totalorder %s1147_s11, 2 }
   0x8   : > { %p435_p5 = scmp.lt.s32.totalorder (!%p360_p3), %s973_s28, 1  ;;  %p437_p6 = scmp.lt.s32.totalorder (!%p360_p3), %s969_s27, 3 }
   0x9   : > { %s1149_s11 = smov (%p39_p4, %s1147_s11), 0  ;;  %363 = sbr.rel (%p360_p3) target bundleno = 925 (0x39d), region = 52 }
   0xa   : > { %s988_s21 = smov (!%p360_p3), 124   ;;  %s990_s22 = smov (!%p360_p3), 4  }
   0xe   : > { %s1151_s28 = smov (!%p435_p5, %s973_s28), 1  ;;  %s1153_s27 = smov (!%p437_p6, %s969_s27), 3  ;;  %vm495_vm0 = vcmask 64512   ;;  %v987_v2 = vmov 0.0   ;;  %vm989_vm1 = vmmov 0   ;;  %v516_v7 = vld [vmem:[%s1136_s5] sm:$0xff]  ;;  %v580_v28 = vlaneseq }
   0xf   : > { %s865_s12 = sshll.u32 %s1151_s28, 2  ;;  %881 = vmatprep.subr.bf16.mxu0 %v987_v2  ;;  %496 = vst.msk [vmem:[#allocation4] sm:$0xff] %vm495_vm0, %v987_v2  ;;  %887 = vmatprep.subr.bf16.mxu1 %v987_v2  ;;  %vm510_vm2 = vcmask 31744   ;;  %v526_v8 = vld [vmem:[%s1137_s6] sm:$0xff]  ;;  %s478_s18 = scalar_lea.vmem %s1138_s7, %s1151_s28  ;;  %v991_v25 = vmov 0   ;;  %vm492_vm4 = vcmask 7168  }
  0x10   : > { %s440_s13 = sadd.s32 %s865_s12, %s1153_s27  ;;  %883 = vmatprep.mubr.msk.bf16.mxu0 %vm989_vm1, %v987_v2  ;;  %889 = vmatprep.mubr.msk.bf16.mxu1 %vm989_vm1, %v987_v2  ;;  %v501_v14 = vld [vmem:[%s1134_s3] sm:$0xff]  ;;  %v992_v27 = vmov -1e+30   ;;  %494 = vst.msk [vmem:[#allocation3] sm:$0xff] %vm492_vm4, %v987_v2  ;;  %v581_v29 = vshrl.u32 %v580_v28, 7  ;;  %vm622_vm6 = vcmask 1043456  }
  0x11   : > { %s1071_s14 = sshll.u32 %s440_s13, 2  ;;  %v512_v15 = vld [vmem:[%s1135_s4] sm:$0xff]  ;;  %939 = vset.pattern.permute.xlu1 %v991_v25  ;;  %940 = vset.pattern.permute.xlu0 %v991_v25  ;;  %493 = vst.msk [vmem:[#allocation2] sm:$0xff] %vm492_vm4, %v992_v27  ;;  %vm682_vm7 = vcmask 60416  }
  0x12   : > { %s453_s17 = scalar_lea.vmem %s1132_s1, %s1071_s14  ;;  %s442_s20 = scalar_lea.vmem %s1131_s0, %s1071_s14  ;;  %v577_v24 = vld [vmem:[%s478_s18] sm:$0x1]  ;;  %v582_v30 = vsub.s32 0, %v581_v29 }
  0x13   : > { %v499_v0 = vld [vmem:[%s453_s17] sm:$0xf]  ;;  %vm578_vm3 = vcmp.gt.f32.partialorder %v577_v24, 0.5  ;;  %s486_s23 = scalar_lea.vmem %s1139_s8, %s1071_s14 }
  0x14   : > { %v497_v1 = vld [vmem:[%s442_s20] sm:$0xf]  ;;  %v500_v3 = vunpack.c.l.bf16 %v499_v0  ;;  %v579_v26 = vsel %vm578_vm3, 1, %v991_v25  ;;  %s464_s20 = scalar_lea.vmem %s1133_s2, %s1071_s14 }
  0x15   : > { %v498_v4 = vunpack.c.l.bf16 %v497_v1  ;;  %v583_v31 = vrot.slane %v579_v26, %v582_v30  ;;  %v618_v42 = vld [vmem:[%s464_s20] sm:$0xf] }
  0x16   : > { %519 = vrot.lane.b32.xlu0 %v500_v3, %s988_s21  ;;  %v517_v11 = vmul.f32 %v516_v7, %v500_v3  ;;  %v624_v44 = vsel %vm622_vm6, %v618_v42, 0  ;;  %v610_v58 = vld [vmem:[#allocation4] sm:$0xff] }
  0x17   : > { %504 = vrot.lane.b32.xlu1 %v498_v4, %s988_s21  ;;  %v502_v18 = vmul.f32 %v501_v14, %v498_v4  ;;  %vm584_vm5 = vcmp.eq.s32.totalorder %v583_v31, 1  ;;  %888 = vmatpush3.bf16.msra.mxu1 %v624_v44  ;;  %v602_v52 = vld [vmem:[#allocation3] sm:$0xff] }
  0x18   : > { %v586_v38 = vld [vmem:[#allocation2] sm:$0xff] }
  0x1a   : > { %522 = vrot.lane.b32.xlu0 %v500_v3, %s990_s22 }
  0x1b   : > { %507 = vrot.lane.b32.xlu1 %v498_v4, %s990_s22 }
  0x88   : > { %v520_v5 = vpop.permute.xlu0 %519 }
  0x89   : > { %v505_v6 = vpop.permute.xlu1 %504 }
  0x8c   : > { %v523_v9 = vpop.permute.xlu0 %522 }
  0x8d   : > { %v508_v10 = vpop.permute.xlu1 %507  ;;  %v525_v12 = vsel %vm510_vm2, %v520_v5, %v523_v9 }
  0x8e   : > { %v527_v13 = vmul.f32 %v526_v8, %v525_v12  ;;  %v511_v16 = vsel %vm510_vm2, %v505_v6, %v508_v10 }
  0x8f   : > { %v513_v19 = vmul.f32 %v512_v15, %v511_v16 }
  0x90   : > { %v528_v17 = vadd.f32 %v527_v13, %v517_v11 }
  0x91   : > { %v514_v22 = vadd.f32 %v513_v19, %v502_v18 }
  0x92   : > { %v529_v20 = vpack.c.bf16 %v528_v17, %v528_v17 }
  0x93   : > { %v515_v23 = vpack.c.bf16 %v514_v22, %v514_v22 }
  0x94   : > { %v535_v21 = vsel %vm495_vm0, %v529_v20, 0 }
  0x95   : > { %882 = vmatpush3.bf16.xpose.msra.mxu0 %v535_v21 }
  0x9c   : > { %884 = vmatmul.mubr.msk.bf16.vlgmr.msra.gmra.mxu0 %vm495_vm0, %v515_v23 }
 0x15c   : > { %v571_v32 = vpop.f32.mrf.mxu0 }
 0x15d   : > { %v585_v33 = vsel %vm584_vm5, %v571_v32, -1e+30 }
 0x15e   : > { %v885_v34 = vpop.f32.mrf.mxu0  ;;  %v587_v35 = vsel %vm495_vm0, %v585_v33, -inf }
 0x15f   : > { %588 = vmax.xlane.f32.xlu0 %v587_v35 }
 0x160   : > { %v574_v36 = vpop.f32.mrf.mxu0 }
 0x162   : > { %v886_v37 = vpop.f32.mrf.mxu0 }
 0x1e8   : > { %v589_v39 = vpop.xlane.xlu0 %588 }
 0x1e9   : > { %v590_v40 = vmax.f32 %v586_v38, %v589_v39 }
 0x1eb   : > { %v591_v41 = vsub.f32 %v586_v38, %v590_v40  ;;  %668 = vst.msk [vmem:[#allocation2] sm:$0xff] %vm492_vm4, %v590_v40  ;;  %596 = vperm.xlu1 %939, %v590_v40  }
 0x1ed   : > { %v592_v43 = vmul.f32 1.442695, %v591_v41 }
 0x1ef   : > { %941 = vpow2.f32 %v592_v43 }
 0x1fc   : > { %v942_v45 = vpop.eup %941 }
 0x1fd   : > { %613 = vperm.xlu0 %940, %v942_v45   ;;  %v603_v53 = vmul.f32 %v942_v45, %v602_v52 }
 0x266   : > { %v597_v46 = vpop.permute.xlu1 %596 }
 0x267   : > { %v599_v47 = vsub.f32 %v585_v33, %v597_v46 }
 0x269   : > { %v600_v48 = vmul.f32 1.442695, %v599_v47 }
 0x26b   : > { %943 = vpow2.f32 %v600_v48 }
 0x278   : > { %v944_v49 = vpop.eup %943  ;;  %v614_v59 = vpop.permute.xlu0 %613 }
 0x279   : > { %v604_v50 = vsel %vm495_vm0, %v944_v49, 0.0  ;;  %v617_v51 = vpack.c.bf16 %v944_v49, %v944_v49  ;;  %v616_v60 = vmul.f32 %v614_v59, %v610_v58 }
 0x27a   : > { %605 = vadd.xlane.f32.xlu1 %v604_v50 }
 0x27b   : > { %890 = vmatmul.mubr.msk.bf16.vlgmr.msra.gmra.mxu1 %vm495_vm0, %v617_v51 }
 0x303   : > { %v606_v54 = vpop.xlane.xlu1 %605 }
 0x304   : > { %v607_v55 = vadd.f32 %v606_v54, %v603_v53 }
 0x306   : > { %609 = vst.msk [vmem:[#allocation3] sm:$0xff] %vm492_vm4, %v607_v55 }
 0x30d   : > { %v673_v56 = vld [vmem:[#allocation3] sm:$0xff] }
 0x30e   : > { %945 = vrcp.f32 %v673_v56 }
 0x31b   : > { %v946_v57 = vpop.eup %945 }
 0x31c   : > { %677 = vperm.xlu1 %939, %v946_v57  }
 0x33b   : > { %v660_v61 = vpop.f32.mrf.mxu1 }
 0x33c   : > { %v666_v62 = vadd.f32 %v660_v61, %v616_v60 }
 0x33d   : > { %v891_v63 = vpop.f32.mrf.mxu1 }
 0x33e   : > { %667 = vst.msk [vmem:[#allocation4] sm:$0xff] %vm495_vm0, %v666_v62 }
 0x33f   : > { %v663_v0 = vpop.f32.mrf.mxu1 }
 0x341   : > { %v892_v1 = vpop.f32.mrf.mxu1 }
 0x345   : > { %v672_v2 = vld [vmem:[#allocation4] sm:$0xff] }
 0x397   : > { %v678_v3 = vpop.permute.xlu1 %677 }
 0x398   : > { %v680_v4 = vmul.f32 %v678_v3, %v672_v2 }
 0x39a   : > { %v681_v5 = vpack.c.bf16 %v680_v4, %v680_v4 }
 0x39c   : > { %683 = vst.msk [vmem:[%s486_s23] sm:$0xf] %vm682_vm7, %v681_v5 }
 0x39d PF: > { %s18_s9 = sadd.s32 1, %s985_s9   ;;  %s1140_s27 = smov %s977_s29 }
 0x39e   : > { %p15_p7 = scmp.ge.s32.totalorder %s18_s9, 10   ;;  %s1141_s28 = smov %s981_s30 }
 0x39f   : > { %s1142_s29 = smov %s1145_s10  ;;  %s1143_s30 = smov %s1149_s11 }
 0x3a0   :  { %17 = sbr.rel (!%p15_p7) target bundleno = 3 (0x3), region = 105 }

// kernel: transformer_forward.28
= control target key start
LH: loop header
LB: loop body
LE: loop exit
PB: predicated region body
PF: predicated region fallthrough
CT: control target
= control target key end

     0   :  { %vm37_vm0 = vcmask 261120   ;;  %v409_v6 = vmov 0.0   ;;  %vm410_vm1 = vmmov 0   ;;  %vm250_vm2 = vcmask 523264   ;;  %s537_s0 = inlined_call_operand.vmem [shape: f32[16,32], index: 0, kind: input, shape index: {}]   ;;  %s538_s2 = inlined_call_operand.vmem [shape: bf16[32,64], index: 2, kind: input, shape index: {}]   ;;  %s539_s4 = inlined_call_operand.vmem [shape: bf16[32,64], index: 4, kind: input, shape index: {}]   ;;  %s540_s1 = inlined_call_operand.vmem [shape: f32[1,32], index: 1, kind: input, shape index: {}]   ;;  %s541_s6 = inlined_call_operand.vmem [shape: bf16[64,32], index: 6, kind: input, shape index: {}]   ;;  %s542_s5 = inlined_call_operand.vmem [shape: f32[1,64], index: 5, kind: input, shape index: {}]   ;;  %s543_s3 = inlined_call_operand.vmem [shape: f32[1,64], index: 3, kind: input, shape index: {}]   ;;  %s544_s7 = inlined_call_operand.vmem [shape: f32[1,32], index: 7, kind: input, shape index: {}]   ;;  %s545_s8 = inlined_call_operand.vmem [shape: f32[1,32], index: 8, kind: input, shape index: {}]   ;;  %s546_s9 = inlined_call_operand.vmem [shape: f32[16,32], index: 9, kind: output, shape index: {}]  }
   0x1   :  { %v464_v0 = vld [vmem:[%s537_s0] sm:$0xff]  ;;  %v469_v1 = vld [vmem:[%s537_s0 + $0x8] sm:$0xff]  ;;  %359 = vmatprep.subr.bf16.mxu1 %v409_v6  ;;  %38 = vst.msk [vmem:[#allocation2] sm:$0xff] %vm37_vm0, %v409_v6  ;;  %39 = vst.msk [vmem:[#allocation2 + $0x8] sm:$0xff] %vm37_vm0, %v409_v6  ;;  %363 = vmatprep.mubr.msk.bf16.mxu1 %vm410_vm1, %v409_v6 }
   0x2   :  { %v42_v2 = vmul.f32 %v464_v0, %v464_v0  ;;  %v43_v3 = vmul.f32 %v469_v1, %v469_v1  ;;  %v389_v7 = vld [vmem:[%s538_s2 + $0x8] sm:$0xff]   ;;  %375 = vmatprep.subr.bf16.mxu0 %v409_v6  ;;  %383 = vmatprep.mubr.msk.bf16.mxu0 %vm410_vm1, %v409_v6  ;;  %v390_v8 = vld [vmem:[%s538_s2] sm:$0xff]   ;;  %v393_v25 = vld [vmem:[%s541_s6 + $0x18] sm:$0xff]  }
   0x3   :  { %360 = vmatpush3.bf16.msra.mxu1 %v389_v7  ;;  %v330_v18 = vld [vmem:[%s540_s1] ss:$0 sm:$0xff]  ;;  %v391_v22 = vld [vmem:[%s539_s4 + $0x8] sm:$0xff]   ;;  %376 = vmatpush3.bf16.msra.mxu0 %v393_v25  ;;  %v394_v26 = vld [vmem:[%s541_s6 + $0x10] sm:$0xff]  }
   0x4   :  { %v45_v4 = vsel %vm37_vm0, %v42_v2, 0.0  ;;  %v48_v5 = vsel %vm37_vm0, %v43_v3, 0.0  ;;  %361 = vmatprep.subr.bf16.mxu1 %v409_v6  ;;  %v392_v24 = vld [vmem:[%s539_s4] sm:$0xff]   ;;  %377 = vmatprep.subr.bf16.mxu0 %v409_v6  ;;  %v395_v27 = vld [vmem:[%s541_s6 + $0x8] sm:$0xff]  }
   0x5   :  { %46 = vadd.xlane.f32.xlu0 %v45_v4  ;;  %v396_v28 = vld [vmem:[%s541_s6] sm:$0xff]  }
   0x6   :  { %v335_v33 = vld [vmem:[%s542_s5] ss:$0 sm:$0xff] }
   0x7   :  { %362 = vmatpush3.bf16.msra.mxu1 %v390_v8  ;;  %378 = vmatpush3.bf16.msra.mxu0 %v394_v26  ;;  %v331_v46 = vld [vmem:[%s543_s3] ss:$0 sm:$0xff] }
   0x8   :  { %367 = vmatprep.subr.bf16.mxu1 %v409_v6  ;;  %379 = vmatprep.subr.bf16.mxu0 %v409_v6  ;;  %v216_v54 = vld [vmem:[#allocation2] sm:$0xff]  ;;  %v217_v58 = vld [vmem:[#allocation2 + $0x8] sm:$0xff] }
   0x9   :  { %49 = vadd.xlane.f32.xlu0 %v48_v5  ;;  %v346_v62 = vld [vmem:[%s544_s7] ss:$0 sm:$0xff] }
   0xa   :  { %v347_v63 = vld [vmem:[%s545_s8] ss:$0 sm:$0xff] }
   0xb   :  { %380 = vmatpush3.bf16.msra.mxu0 %v395_v27 }
   0xc   :  { %381 = vmatprep.subr.bf16.mxu0 %v409_v6 }
   0xf   :  { %382 = vmatpush3.bf16.msra.mxu0 %v396_v28 }
  0x8e   :  { %v47_v9 = vpop.xlane.xlu0 %46 }
  0x8f   :  { %v52_v10 = vmul.f32 0.03125, %v47_v9 }
  0x91   :  { %v54_v11 = vadd.f32 1e-06, %v52_v10 }
  0x92   :  { %v50_v12 = vpop.xlane.xlu0 %49 }
  0x93   :  { %397 = vrsqrt.f32 %v54_v11  ;;  %v53_v13 = vmul.f32 0.03125, %v50_v12 }
  0x95   :  { %v55_v14 = vadd.f32 1e-06, %v53_v13 }
  0x97   :  { %399 = vrsqrt.f32 %v55_v14 }
  0xa0   :  { %v398_v15 = vpop.eup %397 }
  0xa1   :  { %v58_v16 = vmul.f32 %v398_v15, %v464_v0 }
  0xa3   :  { %v67_v20 = vmul.f32 %v330_v18, %v58_v16 }
  0xa4   :  { %v400_v17 = vpop.eup %399 }
  0xa5   :  { %v59_v19 = vmul.f32 %v400_v17, %v469_v1 }
  0xa7   :  { %v68_v21 = vmul.f32 %v330_v18, %v59_v19 }
  0xa9   :  { %v69_v23 = vpack.c.bf16 %v68_v21, %v67_v20 }
  0xab   :  { %364 = vmatmul.mubr.msk.bf16.vlgmr.msra.gmra.mxu1 %vm37_vm0, %v69_v23 }
  0xac   :  { %368 = vmatpush3.bf16.msra.mxu1 %v391_v22  ;;  %371 = vmatprep.mubr.msk.bf16.mxu1 %vm410_vm1, %v409_v6 }
  0xad   :  { %369 = vmatprep.subr.bf16.mxu1 %v409_v6 }
  0xb0   :  { %370 = vmatpush3.bf16.msra.mxu1 %v392_v24 }
  0xb3   :  { %372 = vmatmul.mubr.msk.bf16.vlgmr.msra.gmra.mxu1 %vm37_vm0, %v69_v23 }
 0x16b   :  { %v130_v29 = vpop.f32.mrf.mxu1 }
 0x16c   :  { %v131_v48 = vadd.f32 %v331_v46, %v130_v29 }
 0x16d   :  { %v365_v30 = vpop.f32.mrf.mxu1 }
 0x16f   :  { %v133_v31 = vpop.f32.mrf.mxu1 }
 0x170   :  { %v134_v49 = vadd.f32 %v331_v46, %v133_v31 }
 0x171   :  { %v366_v32 = vpop.f32.mrf.mxu1 }
 0x173   :  { %v194_v34 = vpop.f32.mrf.mxu1 }
 0x174   :  { %v195_v35 = vadd.f32 %v335_v33, %v194_v34 }
 0x175   :  { %v373_v36 = vpop.f32.mrf.mxu1 }
 0x176   :  { %v339_v37 = vmul.f32 -1.442695, %v195_v35 }
 0x177   :  { %v197_v38 = vpop.f32.mrf.mxu1 }
 0x178   :  { %401 = vpow2.f32 %v339_v37  ;;  %v198_v39 = vadd.f32 %v335_v33, %v197_v38 }
 0x179   :  { %v374_v40 = vpop.f32.mrf.mxu1 }
 0x17a   :  { %v340_v41 = vmul.f32 -1.442695, %v198_v39 }
 0x17c   :  { %403 = vpow2.f32 %v340_v41 }
 0x185   :  { %v402_v42 = vpop.eup %401 }
 0x186   :  { %v207_v43 = vadd.f32 1.0, %v402_v42 }
 0x188   :  { %405 = vrcp.f32 %v207_v43 }
 0x189   :  { %v404_v44 = vpop.eup %403 }
 0x18a   :  { %v208_v45 = vadd.f32 1.0, %v404_v44 }
 0x18c   :  { %407 = vrcp.f32 %v208_v45 }
 0x195   :  { %v406_v47 = vpop.eup %405 }
 0x196   :  { %v213_v51 = vmul.f32 %v406_v47, %v131_v48 }
 0x199   :  { %v408_v50 = vpop.eup %407 }
 0x19a   :  { %v214_v52 = vmul.f32 %v408_v50, %v134_v49 }
 0x19c   :  { %v215_v53 = vpack.c.bf16 %v214_v52, %v213_v51 }
 0x19e   :  { %384 = vmatmul.mubr.msk.bf16.vlgmr.msra.gmra.mxu0 %vm250_vm2, %v215_v53 }
 0x25e   :  { %v288_v55 = vpop.f32.mrf.mxu0 }
 0x25f   :  { %v295_v56 = vadd.f32 %v288_v55, %v216_v54 }
 0x260   :  { %v385_v57 = vpop.f32.mrf.mxu0 }
 0x261   :  { %297 = vst.msk [vmem:[#allocation2] sm:$0xff] %vm37_vm0, %v295_v56 }
 0x262   :  { %v291_v59 = vpop.f32.mrf.mxu0 }
 0x263   :  { %v296_v60 = vadd.f32 %v291_v59, %v217_v58 }
 0x264   :  { %v386_v61 = vpop.f32.mrf.mxu0 }
 0x265   :  { %298 = vst.msk [vmem:[#allocation2 + $0x8] sm:$0xff] %vm37_vm0, %v296_v60 }
 0x268   :  { %v303_v2 = vld [vmem:[#allocation2] sm:$0xff] }
 0x269   :  { %v312_v3 = vadd.f32 %v346_v62, %v303_v2 }
 0x26b   :  { %v320_v4 = vmul.f32 %v347_v63, %v312_v3 }
 0x26c   :  { %v304_v5 = vld [vmem:[#allocation2 + $0x8] sm:$0xff] }
 0x26d   :  { %v322_v6 = vadd.f32 %v320_v4, %v464_v0  ;;  %v313_v7 = vadd.f32 %v346_v62, %v304_v5 }
 0x26f   :  { %324 = vst.msk [vmem:[%s546_s9] sm:$0xff] %vm37_vm0, %v322_v6  ;;  %v321_v8 = vmul.f32 %v347_v63, %v313_v7 }
 0x271   :  { %v323_v9 = vadd.f32 %v321_v8, %v469_v1 }
 0x273   :  { %325 = vst.msk [vmem:[%s546_s9 + $0x8] sm:$0xff] %vm37_vm0, %v323_v9 }

// kernel: transformer_forward.49
= control target key start
LH: loop header
LB: loop body
LE: loop exit
PB: predicated region body
PF: predicated region fallthrough
CT: control target
= control target key end

     0   :  { %vm23_vm0 = vcmask 261120   ;;  %s238_s0 = inlined_call_operand.vmem [shape: f32[16,32], index: 0, kind: input, shape index: {}]   ;;  %s239_s1 = inlined_call_operand.vmem [shape: f32[1,32], index: 1, kind: input, shape index: {}]   ;;  %s240_s2 = inlined_call_operand.vmem [shape: bf16[32,64], index: 2, kind: input, shape index: {}]   ;;  %s241_s3 = inlined_call_operand.vmem [shape: f32[1,64], index: 3, kind: input, shape index: {}]   ;;  %s242_s4 = inlined_call_operand.hbm [shape: f32[16,64], index: 4, kind: output, shape index: {}]  }
   0x1   :  { %v19_v0 = vld [vmem:[%s238_s0] sm:$0xff]  ;;  %v20_v1 = vld [vmem:[%s238_s0 + $0x8] sm:$0xff] }
   0x2   :  { %v21_v2 = vmul.f32 %v19_v0, %v19_v0  ;;  %v22_v3 = vmul.f32 %v20_v1, %v20_v1 }
   0x3   :  { %9 = vsyncpa [#allocation3], 0  ;;  %v156_v6 = vld [vmem:[%s240_s2 + $0x8] sm:$0xff]   ;;  %v184_v7 = vmov 0.0   ;;  %vm185_vm1 = vmmov 0   ;;  %v157_v8 = vld [vmem:[%s240_s2] sm:$0xff]  }
   0x4   :  { %v24_v4 = vsel %vm23_vm0, %v21_v2, 0.0  ;;  %v27_v5 = vsel %vm23_vm0, %v22_v3, 0.0  ;;  %143 = vmatprep.subr.bf16.mxu0 %v184_v7  ;;  %147 = vmatprep.mubr.msk.bf16.mxu0 %vm185_vm1, %v184_v7  ;;  %v135_v18 = vld [vmem:[%s239_s1] ss:$0 sm:$0xff]  ;;  %vm116_vm2 = vcmask 523264   ;;  %s186_s25 = smov [#allocation2]  }
   0x5   :  { %25 = vadd.xlane.f32.xlu0 %v24_v4  ;;  %144 = vmatpush3.bf16.msra.mxu0 %v156_v6  ;;  %v136_v23 = vld [vmem:[%s241_s3] ss:$0 sm:$0xff]  ;;  %s124_s26 = sshll.u32 %s186_s25, 4  ;;  %s125_s26 = int_to_ptr.vmem [resolvable:$true] %s124_s26 }
   0x6   :  { %145 = vmatprep.subr.bf16.mxu0 %v184_v7  ;;  %s162_s1 = scalar_lea.vmem %s125_s26, 256  ;;  %p167_p1 = scmp.lt.s32.totalorder %s125_s26, %s125_s26 }
   0x7   :  { %p163_p0 = scmp.ne.s32.totalorder %s125_s26, %s162_s1  ;;  %p168_p2 = scmp.lt.s32.totalorder %s162_s1, %s162_s1 }
   0x9   :  { %28 = vadd.xlane.f32.xlu0 %v27_v5  ;;  %146 = vmatpush3.bf16.msra.mxu0 %v157_v8  ;;  %p169_p3 = por %p168_p2, %p167_p1 }
   0xb   :  { %p170_p4 = pnand %p169_p3, %p163_p0 }
  0x8e   :  { %v26_v9 = vpop.xlane.xlu0 %25 }
  0x8f   :  { %v31_v10 = vmul.f32 0.03125, %v26_v9 }
  0x91   :  { %v33_v11 = vadd.f32 1e-06, %v31_v10 }
  0x92   :  { %v29_v12 = vpop.xlane.xlu0 %28 }
  0x93   :  { %158 = vrsqrt.f32 %v33_v11  ;;  %v32_v13 = vmul.f32 0.03125, %v29_v12 }
  0x95   :  { %v34_v14 = vadd.f32 1e-06, %v32_v13 }
  0x97   :  { %160 = vrsqrt.f32 %v34_v14 }
  0xa0   :  { %v159_v15 = vpop.eup %158 }
  0xa1   :  { %v37_v16 = vmul.f32 %v159_v15, %v19_v0 }
  0xa3   :  { %v46_v20 = vmul.f32 %v135_v18, %v37_v16 }
  0xa4   :  { %v161_v17 = vpop.eup %160 }
  0xa5   :  { %v38_v19 = vmul.f32 %v161_v17, %v20_v1 }
  0xa7   :  { %v47_v21 = vmul.f32 %v135_v18, %v38_v19 }
  0xa9   :  { %v48_v22 = vpack.c.bf16 %v47_v21, %v46_v20 }
  0xab   :  { %148 = vmatmul.mubr.msk.bf16.vlgmr.msra.gmra.mxu0 %vm23_vm0, %v48_v22 }
 0x16b   :  { %v109_v24 = vpop.f32.mrf.mxu0 }
 0x16c   :  { %v110_v25 = vadd.f32 %v136_v23, %v109_v24 }
 0x16d   :  { %v149_v26 = vpop.f32.mrf.mxu0 }
 0x16e   :  { %117 = vst.msk [vmem:[#allocation2] sm:$0xff] %vm116_vm2, %v110_v25 }
 0x16f   :  { %v112_v27 = vpop.f32.mrf.mxu0 }
 0x170   :  { %v113_v28 = vadd.f32 %v136_v23, %v112_v27 }
 0x171   :  { %v150_v29 = vpop.f32.mrf.mxu0 }
 0x172   :  { %118 = vst.msk [vmem:[#allocation2 + $0x8] sm:$0xff] %vm116_vm2, %v113_v28 }
 0x173   :  { %173 = shalt.err (!%p170_p4)
}
 0x174   :  { %s187_s3 = smov 128   ;;  %s188_s27 = smov 8  }
 0x175   :  { %130 = dma.vmem_to_hbm [thread:$0]  %s125_s26, 256, %s242_s4, [#allocation3], %s187_s3, %s187_s3, %s188_s27  }
 0x176   :  { %182 = dma.done.wait [#allocation3], 256  }
 0x177   :  { %183 = vsyncadd [#allocation3], 4294967040 }
 0x178   :  { %134 = vsyncpa [#allocation3], 1 }

</bundles_post_ra>
